<compile_context>
chip_gen: v6e
topology: v6e:2x2x1
jax: 0.10.0
libtpu: 0.0.40
codegen_flags: <defaults>
</compile_context>

<pallas_src>
import math
import functools

import jax
import jax.numpy as jnp
from jax.experimental import pallas as pl
from jax.experimental.pallas import tpu as pltpu


def _layernorm(x, g, b, eps=1e-5):
    # PyTorch nn.LayerNorm over the last dim (biased variance, eps=1e-5).
    mu = jnp.mean(x, axis=-1, keepdims=True)
    var = jnp.mean((x - mu) ** 2, axis=-1, keepdims=True)
    return (x - mu) * jax.lax.rsqrt(var + eps) * g + b


def decoder_stack_kernel(x_ref, sm_ref, bias_ref,
                         wq_ref, wk_ref, wv_ref, wo_ref,
                         w1_ref, b1_ref, w2_ref, b2_ref,
                         g1_ref, be1_ref, g2_ref, be2_ref,
                         o_ref,
                         xc_ref, att_buf,
                         *, h):
    """One grid step = one (layer, batch) pair.  Layer axis is OUTER so the
    per-layer weight blocks are fetched once per layer and reused across the
    whole batch."""
    _, n, d = x_ref.shape
    dk = d // h
    layer = pl.program_id(0)
    b = pl.program_id(1)

    # Initialize the carried activation for this batch element at the first layer.
    @pl.when(layer == 0)
    def _init_carry():
        xc_ref[b] = x_ref[b]

    x = xc_ref[b]            # (n, d) f32 running activation (residual stream)
    sm = sm_ref[b]           # (n, 1) f32 sequence mask (== q_mas == k_mas)
    bias = bias_ref[...]     # (n, n) f32 additive causal bias (0 / -1e30), loaded once

    scale = jnp.float32(1.0 / math.sqrt(dk))

    # bf16 operands for every matmul; accumulation stays f32.
    xb = x.astype(jnp.bfloat16)
    xmb = (x * sm).astype(jnp.bfloat16)   # masked rows exactly zero -> zero K/V rows

    # ---------------- self attention ----------------
    qp = jnp.dot(xb, wq_ref[0], preferred_element_type=jnp.float32) * scale
    kp = jnp.dot(xmb, wk_ref[0], preferred_element_type=jnp.float32)
    vp = jnp.dot(xmb, wv_ref[0], preferred_element_type=jnp.float32)
    qpb = qp.astype(jnp.bfloat16)
    kpb = kp.astype(jnp.bfloat16)
    vpb = vp.astype(jnp.bfloat16)

    for hd in range(h):                   # static unrolled loop over heads (h small)
        lo = hd * dk
        qh = qpb[:, lo:lo + dk]           # (n, dk) bf16
        kh = kpb[:, lo:lo + dk]
        vh = vpb[:, lo:lo + dk]
        # scores: contract dk without an explicit transpose; f32 accumulate
        s = jax.lax.dot_general(qh, kh, (((1,), (1,)), ((), ())),
                                preferred_element_type=jnp.float32) + bias
        m = jnp.max(s, axis=-1, keepdims=True)
        e = jnp.exp(s - m)                # causally-masked entries underflow to exactly 0
        p = e / jnp.sum(e, axis=-1, keepdims=True)   # exact reciprocal (review concern)
        att_buf[:, lo:lo + dk] = jnp.dot(p.astype(jnp.bfloat16), vh,
                                         preferred_element_type=jnp.float32)

    # One full-K matmul with WO instead of h small-K matmuls.
    att = jnp.dot(att_buf[...].astype(jnp.bfloat16), wo_ref[0],
                  preferred_element_type=jnp.float32)

    x1 = _layernorm(x + att, g1_ref[0], be1_ref[0])

    # ---------------- FFN ----------------
    h1 = jnp.maximum(
        jnp.dot(x1.astype(jnp.bfloat16), w1_ref[0],
                preferred_element_type=jnp.float32) + b1_ref[0], 0.0)
    h2 = jnp.dot(h1.astype(jnp.bfloat16), w2_ref[0],
                 preferred_element_type=jnp.float32) + b2_ref[0]

    x2 = _layernorm(x1 + h2, g2_ref[0], be2_ref[0]) * sm   # per-layer re-mask (required)

    xc_ref[b] = x2
    # Write the current state for this batch element every step; the final
    # (last-layer) write is what remains in HBM.  Avoids stale-buffer writebacks.
    o_ref[0] = x2


def decoder_forward(x, seq_mas, params, pos_emb, *, h):
    """x: (bs, n, d); seq_mas: (bs, n); params: per-layer weights stacked on a
    leading layer axis (matmul weights in bf16, biases/LayerNorm params in f32)."""
    bs, n, d = x.shape
    wq = params[0]
    num_layers = wq.shape[0]

    sm = seq_mas.reshape(bs, n, 1).astype(jnp.float32)
    x = (x + pos_emb[:n, :][None, :, :]).astype(jnp.float32)

    # Additive causal bias, built once outside the kernel and DMA'd exactly once
    # (its block index never changes across the grid).
    causal = jnp.tril(jnp.ones((n, n), jnp.float32))
    bias = jnp.where(causal > 0, 0.0, -1e30).astype(jnp.float32)

    kernel = functools.partial(decoder_stack_kernel, h=h)

    def weight_spec(p):
        nz = p.ndim - 1
        # index only by layer -> consecutive batch steps reuse the same block (no re-fetch)
        return pl.BlockSpec((1,) + p.shape[1:], lambda l, b, _nz=nz: (l,) + (0,) * _nz)

    in_specs = [
        # whole-array blocks with a constant index -> fetched once for the whole grid
        pl.BlockSpec((bs, n, d), lambda l, b: (0, 0, 0)),   # x (initial activation)
        pl.BlockSpec((bs, n, 1), lambda l, b: (0, 0, 0)),   # sequence mask
        pl.BlockSpec((n, n),     lambda l, b: (0, 0)),      # causal additive bias
    ] + [weight_spec(p) for p in params]                    # per-layer weights (bf16)

    return pl.pallas_call(
        kernel,
        out_shape=jax.ShapeDtypeStruct((bs, n, d), jnp.float32),
        grid=(num_layers, bs),                 # layer OUTER, batch INNER
        in_specs=in_specs,
        out_specs=pl.BlockSpec((1, n, d), lambda l, b: (b, 0, 0)),
        scratch_shapes=[
            pltpu.VMEM((bs, n, d), jnp.float32),   # activation carry across layers
            pltpu.VMEM((n, d), jnp.float32),       # concat(heads) buffer for fused WO matmul
        ],
        # Both axes "arbitrary": sequential layer carry + batch revisit of weight
        # blocks; (parallel-after-arbitrary ordering is avoided for portability).
        # On v6e/v5e with large d/d_hid raise vmem_limit_bytes further (<=96 MiB);
        # 48 MiB keeps headroom on v7x's 64 MiB VMEM.
        compiler_params=pltpu.CompilerParams(
            dimension_semantics=("arbitrary", "arbitrary"),
            vmem_limit_bytes=48 * 1024 * 1024),
    )(x, sm, bias, *params)


def init_decoder_params(key, *, num_layers, d_model, d_hid):
    """Deterministic synthetic init mirroring the PyTorch module's shapes.
    Linear weights pre-transposed (y = x @ W), xavier-normal, stored bf16;
    biases zero / LayerNorm gamma=1, beta=0 in f32.  All per-layer params are
    stacked on a leading layer axis so the kernel streams them per layer."""
    def xavier(k, shape):
        fan_in, fan_out = shape[-2], shape[-1]
        std = math.sqrt(2.0 / (fan_in + fan_out))
        return (std * jax.random.normal(k, shape)).astype(jnp.float32)

    keys = jax.random.split(key, 7)
    L = num_layers
    wq = xavier(keys[0], (L, d_model, d_model)).astype(jnp.bfloat16)
    wk = xavier(keys[1], (L, d_model, d_model)).astype(jnp.bfloat16)
    wv = xavier(keys[2], (L, d_model, d_model)).astype(jnp.bfloat16)
    wo = xavier(keys[3], (L, d_model, d_model)).astype(jnp.bfloat16)
    w1 = xavier(keys[4], (L, d_model, d_hid)).astype(jnp.bfloat16)
    w2 = xavier(keys[5], (L, d_hid, d_model)).astype(jnp.bfloat16)
    b1 = jnp.zeros((L, 1, d_hid), jnp.float32)
    b2 = jnp.zeros((L, 1, d_model), jnp.float32)
    g1 = jnp.ones((L, 1, d_model), jnp.float32)
    be1 = jnp.zeros((L, 1, d_model), jnp.float32)
    g2 = jnp.ones((L, 1, d_model), jnp.float32)
    be2 = jnp.zeros((L, 1, d_model), jnp.float32)
    pos_emb = (0.01 * jax.random.normal(keys[6], (1024, d_model))).astype(jnp.float32)
    return (wq, wk, wv, wo, w1, b1, w2, b2, g1, be1, g2, be2), pos_emb


def decoder_reference(x, seq_mas, params, pos_emb, *, h, op_dtype=jnp.float32):
    """Pure-JAX reference matching the PyTorch Decoder (att_mas=None path).
    `op_dtype` selects the matmul operand precision (f32 = module semantics,
    bf16 = numerics matched to the kernel's MXU inputs); softmax / LayerNorm /
    accumulation are always f32."""
    bs, n, d = x.shape
    (wq, wk, wv, wo, w1, b1, w2, b2, g1, be1, g2, be2) = params
    dk = d // h
    scale = 1.0 / math.sqrt(dk)
    sm = seq_mas.reshape(bs, n, 1).astype(jnp.float32)
    sm4 = sm[:, None, :, :]                         # (bs,1,n,1)
    causal = jnp.tril(jnp.ones((n, n), jnp.float32))
    x = (x + pos_emb[:n][None]).astype(jnp.float32)

    def mm(a, w):
        return jnp.dot(a.astype(op_dtype), w.astype(op_dtype),
                       preferred_element_type=jnp.float32)

    def bmm(eq, a, b):
        return jnp.einsum(eq, a.astype(op_dtype), b.astype(op_dtype),
                          preferred_element_type=jnp.float32)

    def ln(v, g, b):
        mu = v.mean(-1, keepdims=True)
        var = ((v - mu) ** 2).mean(-1, keepdims=True)
        return (v - mu) * jax.lax.rsqrt(var + 1e-5) * g + b

    for i in range(wq.shape[0]):
        # scaling Q before QK^T is mathematically identical to PyTorch's
        # post-QK division by sqrt(dk).
        q = (mm(x, wq[i]) * scale).reshape(bs, n, h, dk).transpose(0, 2, 1, 3) * sm4
        k = mm(x, wk[i]).reshape(bs, n, h, dk).transpose(0, 2, 1, 3) * sm4
        v = mm(x, wv[i]).reshape(bs, n, h, dk).transpose(0, 2, 1, 3) * sm4
        s = bmm('bhqd,bhkd->bhqk', q, k)
        s = jnp.where(causal[None, None] > 0, s, -jnp.inf)
        p = jax.nn.softmax(s, axis=-1) * causal[None, None]
        y = bmm('bhqk,bhkd->bhqd', p, v) * sm4
        y = y.transpose(0, 2, 1, 3).reshape(bs, n, d)
        y = mm(y, wo[i]) * sm
        x = ln(x + y, g1[i], be1[i]) * sm
        f = jnp.maximum(mm(x, w1[i]) + b1[i], 0.0)
        f = (mm(f, w2[i]) + b2[i]) * sm
        x = ln(x + f, g2[i], be2[i]) * sm
    return x


if __name__ == "__main__":
    bs, n, d_model, d_hid, h, num_layers = 2, 8, 32, 64, 4, 2

    key = jax.random.PRNGKey(0)
    k_x, k_p = jax.random.split(key)
    x = jax.random.normal(k_x, (bs, n, d_model), dtype=jnp.float32)
    # sequence mask: second batch element has the last 3 positions masked out
    seq_mas = jnp.ones((bs, n), jnp.float32).at[1, 5:].set(0.0)

    params, pos_emb = init_decoder_params(
        k_p, num_layers=num_layers, d_model=d_model, d_hid=d_hid)

    out = decoder_forward(x, seq_mas, params, pos_emb, h=h)
    out = jax.block_until_ready(out)

    assert out.shape == (bs, n, d_model)
    assert bool(jnp.all(jnp.isfinite(out)))
    # masked positions must be zeroed by the final seq_mas multiply
    assert bool(jnp.all(out[1, 5:] == 0.0))

    # Tight check vs a reference with matched bf16 matmul operands.
    ref_bf16 = decoder_reference(x, seq_mas, params, pos_emb, h=h,
                                 op_dtype=jnp.bfloat16)
    err_bf16 = float(jnp.max(jnp.abs(out - ref_bf16)))
    assert err_bf16 < 2e-2, f"max abs err vs bf16-matched reference = {err_bf16}"

    # Loose check vs the full-f32 reference (PyTorch module semantics).
    ref_f32 = decoder_reference(x, seq_mas, params, pos_emb, h=h,
                                op_dtype=jnp.float32)
    err_f32 = float(jnp.max(jnp.abs(out - ref_f32)))
    assert err_f32 < 1.5e-1, f"max abs err vs f32 reference = {err_f32}"

    print("KERNEL_OK")
</pallas_src>

<mosaic_0001>
module attributes {stable_mosaic.version = 11 : i64} {
  func.func @decoder_stack_kernel(%arg0: i32, %arg1: i32, %arg2: memref<2x8x32xf32, #tpu.memory_space<vmem>>, %arg3: memref<2x8x1xf32, #tpu.memory_space<vmem>>, %arg4: memref<8x8xf32, #tpu.memory_space<vmem>>, %arg5: memref<1x32x32xbf16, #tpu.memory_space<vmem>>, %arg6: memref<1x32x32xbf16, #tpu.memory_space<vmem>>, %arg7: memref<1x32x32xbf16, #tpu.memory_space<vmem>>, %arg8: memref<1x32x32xbf16, #tpu.memory_space<vmem>>, %arg9: memref<1x32x64xbf16, #tpu.memory_space<vmem>>, %arg10: memref<1x1x64xf32, #tpu.memory_space<vmem>>, %arg11: memref<1x64x32xbf16, #tpu.memory_space<vmem>>, %arg12: memref<1x1x32xf32, #tpu.memory_space<vmem>>, %arg13: memref<1x1x32xf32, #tpu.memory_space<vmem>>, %arg14: memref<1x1x32xf32, #tpu.memory_space<vmem>>, %arg15: memref<1x1x32xf32, #tpu.memory_space<vmem>>, %arg16: memref<1x1x32xf32, #tpu.memory_space<vmem>>, %arg17: memref<1x8x32xf32, #tpu.memory_space<vmem>>, %arg18: memref<2x8x32xf32, #tpu.memory_space<vmem>>, %arg19: memref<8x32xf32, #tpu.memory_space<vmem>>) attributes {dimension_semantics = [#tpu.dimension_semantics<arbitrary>, #tpu.dimension_semantics<arbitrary>], iteration_bounds = array<i64: 2, 2>, scalar_prefetch = 0 : i64, scratch_operands = 2 : i64, tpu.core_type = #tpu.core_type<tc>, window_params = [{pipeline_mode = #tpu.pipeline_mode<synchronous>, transform_indices = @transform_0, window_bounds = array<i64: 2, 8, 32>}, {pipeline_mode = #tpu.pipeline_mode<synchronous>, transform_indices = @transform_1, window_bounds = array<i64: 2, 8, 1>}, {pipeline_mode = #tpu.pipeline_mode<synchronous>, transform_indices = @transform_2, window_bounds = array<i64: 8, 8>}, {transform_indices = @transform_3, window_bounds = array<i64: 1, 32, 32>}, {transform_indices = @transform_4, window_bounds = array<i64: 1, 32, 32>}, {transform_indices = @transform_5, window_bounds = array<i64: 1, 32, 32>}, {transform_indices = @transform_6, window_bounds = array<i64: 1, 32, 32>}, {transform_indices = @transform_7, window_bounds = array<i64: 1, 32, 64>}, {transform_indices = @transform_8, window_bounds = array<i64: 1, 1, 64>}, {transform_indices = @transform_9, window_bounds = array<i64: 1, 64, 32>}, {transform_indices = @transform_10, window_bounds = array<i64: 1, 1, 32>}, {transform_indices = @transform_11, window_bounds = array<i64: 1, 1, 32>}, {transform_indices = @transform_12, window_bounds = array<i64: 1, 1, 32>}, {transform_indices = @transform_13, window_bounds = array<i64: 1, 1, 32>}, {transform_indices = @transform_14, window_bounds = array<i64: 1, 1, 32>}, {transform_indices = @transform_15, window_bounds = array<i64: 1, 8, 32>}]} {
    %c0_i32 = arith.constant 0 : i32
    %0 = arith.cmpi eq, %arg0, %c0_i32 : i32
    %1 = arith.extui %0 : i1 to i32
    %c0_i32_0 = arith.constant 0 : i32
    %2 = arith.cmpi ne, %1, %c0_i32_0 : i32
    scf.if %2 {
      %182 = arith.index_cast %arg1 : i32 to index
      %c0_87 = arith.constant 0 : index
      %c0_88 = arith.constant 0 : index
      %183 = vector.load %arg2[%182, %c0_87, %c0_88] : memref<2x8x32xf32, #tpu.memory_space<vmem>>, vector<1x8x32xf32>
      %184 = vector.shape_cast %183 : vector<1x8x32xf32> to vector<8x32xf32>
      %185 = arith.index_cast %arg1 : i32 to index
      %c0_89 = arith.constant 0 : index
      %c0_90 = arith.constant 0 : index
      %186 = vector.load %arg18[%185, %c0_89, %c0_90] : memref<2x8x32xf32, #tpu.memory_space<vmem>>, vector<1x8x32xf32>
      %187 = vector.shape_cast %186 : vector<1x8x32xf32> to vector<8x32xf32>
      %188 = vector.shape_cast %184 : vector<8x32xf32> to vector<1x8x32xf32>
      tpu.vector_store %arg18[%185, %c0_89, %c0_90], %188 {strides = array<i32>} : memref<2x8x32xf32, #tpu.memory_space<vmem>>, vector<1x8x32xf32>,
    } else {
    }
    %3 = arith.index_cast %arg1 : i32 to index
    %c0 = arith.constant 0 : index
    %c0_1 = arith.constant 0 : index
    %4 = vector.load %arg18[%3, %c0, %c0_1] : memref<2x8x32xf32, #tpu.memory_space<vmem>>, vector<1x8x32xf32>
    %5 = vector.shape_cast %4 : vector<1x8x32xf32> to vector<8x32xf32>
    %6 = arith.index_cast %arg1 : i32 to index
    %c0_2 = arith.constant 0 : index
    %c0_3 = arith.constant 0 : index
    %7 = vector.load %arg3[%6, %c0_2, %c0_3] : memref<2x8x1xf32, #tpu.memory_space<vmem>>, vector<1x8x1xf32>
    %8 = vector.shape_cast %7 : vector<1x8x1xf32> to vector<8x1xf32>
    %c0_4 = arith.constant 0 : index
    %c0_5 = arith.constant 0 : index
    %9 = vector.load %arg4[%c0_4, %c0_5] : memref<8x8xf32, #tpu.memory_space<vmem>>, vector<8x8xf32>
    %10 = arith.truncf %5 : vector<8x32xf32> to vector<8x32xbf16>
    %11 = vector.broadcast %8 : vector<8x1xf32> to vector<8x32xf32>
    %12 = arith.mulf %5, %11 : vector<8x32xf32>
    %13 = arith.truncf %12 : vector<8x32xf32> to vector<8x32xbf16>
    %c0_6 = arith.constant 0 : index
    %c0_7 = arith.constant 0 : index
    %c0_8 = arith.constant 0 : index
    %14 = vector.load %arg5[%c0_6, %c0_7, %c0_8] : memref<1x32x32xbf16, #tpu.memory_space<vmem>>, vector<1x32x32xbf16>
    %15 = vector.shape_cast %14 : vector<1x32x32xbf16> to vector<32x32xbf16>
    %cst = arith.constant dense<0.000000e+00> : vector<8x32xf32>
    %16 = tpu.matmul %10, %15, %cst {dimension_numbers = #tpu.dot_dimension_numbers<[1], [0], [0], [1], [0, 0, 1, 1], [], []>} : vector<8x32xbf16>, vector<32x32xbf16>, vector<8x32xf32> -> vector<8x32xf32>
    %cst_9 = arith.constant 0.353553385 : f32
    %17 = vector.broadcast %cst_9 : f32 to vector<8x32xf32>
    %18 = arith.mulf %16, %17 : vector<8x32xf32>
    %c0_10 = arith.constant 0 : index
    %c0_11 = arith.constant 0 : index
    %c0_12 = arith.constant 0 : index
    %19 = vector.load %arg6[%c0_10, %c0_11, %c0_12] : memref<1x32x32xbf16, #tpu.memory_space<vmem>>, vector<1x32x32xbf16>
    %20 = vector.shape_cast %19 : vector<1x32x32xbf16> to vector<32x32xbf16>
    %cst_13 = arith.constant dense<0.000000e+00> : vector<8x32xf32>
    %21 = tpu.matmul %13, %20, %cst_13 {dimension_numbers = #tpu.dot_dimension_numbers<[1], [0], [0], [1], [0, 0, 1, 1], [], []>} : vector<8x32xbf16>, vector<32x32xbf16>, vector<8x32xf32> -> vector<8x32xf32>
    %c0_14 = arith.constant 0 : index
    %c0_15 = arith.constant 0 : index
    %c0_16 = arith.constant 0 : index
    %22 = vector.load %arg7[%c0_14, %c0_15, %c0_16] : memref<1x32x32xbf16, #tpu.memory_space<vmem>>, vector<1x32x32xbf16>
    %23 = vector.shape_cast %22 : vector<1x32x32xbf16> to vector<32x32xbf16>
    %cst_17 = arith.constant dense<0.000000e+00> : vector<8x32xf32>
    %24 = tpu.matmul %13, %23, %cst_17 {dimension_numbers = #tpu.dot_dimension_numbers<[1], [0], [0], [1], [0, 0, 1, 1], [], []>} : vector<8x32xbf16>, vector<32x32xbf16>, vector<8x32xf32> -> vector<8x32xf32>
    %25 = arith.truncf %18 : vector<8x32xf32> to vector<8x32xbf16>
    %26 = arith.truncf %21 : vector<8x32xf32> to vector<8x32xbf16>
    %27 = arith.truncf %24 : vector<8x32xf32> to vector<8x32xbf16>
    %28 = vector.extract_strided_slice %25 {offsets = [0, 0], sizes = [8, 8], strides = [1, 1]} : vector<8x32xbf16> to vector<8x8xbf16>
    %29 = vector.extract_strided_slice %26 {offsets = [0, 0], sizes = [8, 8], strides = [1, 1]} : vector<8x32xbf16> to vector<8x8xbf16>
    %30 = vector.extract_strided_slice %27 {offsets = [0, 0], sizes = [8, 8], strides = [1, 1]} : vector<8x32xbf16> to vector<8x8xbf16>
    %cst_18 = arith.constant dense<0.000000e+00> : vector<8x8xf32>
    %31 = tpu.matmul %28, %29, %cst_18 {dimension_numbers = #tpu.dot_dimension_numbers<[1], [1], [0], [0], [0, 0, 1, 0], [], []>} : vector<8x8xbf16>, vector<8x8xbf16>, vector<8x8xf32> -> vector<8x8xf32>
    %32 = arith.addf %31, %9 : vector<8x8xf32>
    %cst_19 = arith.constant dense<0xFF800000> : vector<8xf32>
    %33 = vector.multi_reduction <maximumf>, %32, %cst_19 [1] : vector<8x8xf32> to vector<8xf32>
    %34 = vector.shape_cast %33 : vector<8xf32> to vector<8x1xf32>
    %35 = vector.broadcast %34 : vector<8x1xf32> to vector<8x8xf32>
    %36 = arith.subf %32, %35 : vector<8x8xf32>
    %37 = math.exp %36 : vector<8x8xf32>
    %cst_20 = arith.constant dense<0.000000e+00> : vector<8xf32>
    %38 = vector.multi_reduction <add>, %37, %cst_20 [1] : vector<8x8xf32> to vector<8xf32>
    %39 = vector.shape_cast %38 : vector<8xf32> to vector<8x1xf32>
    %40 = vector.broadcast %39 : vector<8x1xf32> to vector<8x8xf32>
    %41 = arith.divf %37, %40 : vector<8x8xf32>
    %42 = arith.truncf %41 : vector<8x8xf32> to vector<8x8xbf16>
    %cst_21 = arith.constant dense<0.000000e+00> : vector<8x8xf32>
    %43 = tpu.matmul %42, %30, %cst_21 {dimension_numbers = #tpu.dot_dimension_numbers<[1], [0], [0], [1], [0, 0, 1, 1], [], []>} : vector<8x8xbf16>, vector<8x8xbf16>, vector<8x8xf32> -> vector<8x8xf32>
    %c0_22 = arith.constant 0 : index
    %c0_23 = arith.constant 0 : index
    %44 = vector.load %arg19[%c0_22, %c0_23] : memref<8x32xf32, #tpu.memory_space<vmem>>, vector<8x8xf32>
    tpu.vector_store %arg19[%c0_22, %c0_23], %43 {strides = array<i32>} : memref<8x32xf32, #tpu.memory_space<vmem>>, vector<8x8xf32>,
    %45 = vector.extract_strided_slice %25 {offsets = [0, 8], sizes = [8, 8], strides = [1, 1]} : vector<8x32xbf16> to vector<8x8xbf16>
    %46 = vector.extract_strided_slice %26 {offsets = [0, 8], sizes = [8, 8], strides = [1, 1]} : vector<8x32xbf16> to vector<8x8xbf16>
    %47 = vector.extract_strided_slice %27 {offsets = [0, 8], sizes = [8, 8], strides = [1, 1]} : vector<8x32xbf16> to vector<8x8xbf16>
    %cst_24 = arith.constant dense<0.000000e+00> : vector<8x8xf32>
    %48 = tpu.matmul %45, %46, %cst_24 {dimension_numbers = #tpu.dot_dimension_numbers<[1], [1], [0], [0], [0, 0, 1, 0], [], []>} : vector<8x8xbf16>, vector<8x8xbf16>, vector<8x8xf32> -> vector<8x8xf32>
    %49 = arith.addf %48, %9 : vector<8x8xf32>
    %cst_25 = arith.constant dense<0xFF800000> : vector<8xf32>
    %50 = vector.multi_reduction <maximumf>, %49, %cst_25 [1] : vector<8x8xf32> to vector<8xf32>
    %51 = vector.shape_cast %50 : vector<8xf32> to vector<8x1xf32>
    %52 = vector.broadcast %51 : vector<8x1xf32> to vector<8x8xf32>
    %53 = arith.subf %49, %52 : vector<8x8xf32>
    %54 = math.exp %53 : vector<8x8xf32>
    %cst_26 = arith.constant dense<0.000000e+00> : vector<8xf32>
    %55 = vector.multi_reduction <add>, %54, %cst_26 [1] : vector<8x8xf32> to vector<8xf32>
    %56 = vector.shape_cast %55 : vector<8xf32> to vector<8x1xf32>
    %57 = vector.broadcast %56 : vector<8x1xf32> to vector<8x8xf32>
    %58 = arith.divf %54, %57 : vector<8x8xf32>
    %59 = arith.truncf %58 : vector<8x8xf32> to vector<8x8xbf16>
    %cst_27 = arith.constant dense<0.000000e+00> : vector<8x8xf32>
    %60 = tpu.matmul %59, %47, %cst_27 {dimension_numbers = #tpu.dot_dimension_numbers<[1], [0], [0], [1], [0, 0, 1, 1], [], []>} : vector<8x8xbf16>, vector<8x8xbf16>, vector<8x8xf32> -> vector<8x8xf32>
    %c0_28 = arith.constant 0 : index
    %c8 = arith.constant 8 : index
    %61 = vector.load %arg19[%c0_28, %c8] : memref<8x32xf32, #tpu.memory_space<vmem>>, vector<8x8xf32>
    tpu.vector_store %arg19[%c0_28, %c8], %60 {strides = array<i32>} : memref<8x32xf32, #tpu.memory_space<vmem>>, vector<8x8xf32>,
    %62 = vector.extract_strided_slice %25 {offsets = [0, 16], sizes = [8, 8], strides = [1, 1]} : vector<8x32xbf16> to vector<8x8xbf16>
    %63 = vector.extract_strided_slice %26 {offsets = [0, 16], sizes = [8, 8], strides = [1, 1]} : vector<8x32xbf16> to vector<8x8xbf16>
    %64 = vector.extract_strided_slice %27 {offsets = [0, 16], sizes = [8, 8], strides = [1, 1]} : vector<8x32xbf16> to vector<8x8xbf16>
    %cst_29 = arith.constant dense<0.000000e+00> : vector<8x8xf32>
    %65 = tpu.matmul %62, %63, %cst_29 {dimension_numbers = #tpu.dot_dimension_numbers<[1], [1], [0], [0], [0, 0, 1, 0], [], []>} : vector<8x8xbf16>, vector<8x8xbf16>, vector<8x8xf32> -> vector<8x8xf32>
    %66 = arith.addf %65, %9 : vector<8x8xf32>
    %cst_30 = arith.constant dense<0xFF800000> : vector<8xf32>
    %67 = vector.multi_reduction <maximumf>, %66, %cst_30 [1] : vector<8x8xf32> to vector<8xf32>
    %68 = vector.shape_cast %67 : vector<8xf32> to vector<8x1xf32>
    %69 = vector.broadcast %68 : vector<8x1xf32> to vector<8x8xf32>
    %70 = arith.subf %66, %69 : vector<8x8xf32>
    %71 = math.exp %70 : vector<8x8xf32>
    %cst_31 = arith.constant dense<0.000000e+00> : vector<8xf32>
    %72 = vector.multi_reduction <add>, %71, %cst_31 [1] : vector<8x8xf32> to vector<8xf32>
    %73 = vector.shape_cast %72 : vector<8xf32> to vector<8x1xf32>
    %74 = vector.broadcast %73 : vector<8x1xf32> to vector<8x8xf32>
    %75 = arith.divf %71, %74 : vector<8x8xf32>
    %76 = arith.truncf %75 : vector<8x8xf32> to vector<8x8xbf16>
    %cst_32 = arith.constant dense<0.000000e+00> : vector<8x8xf32>
    %77 = tpu.matmul %76, %64, %cst_32 {dimension_numbers = #tpu.dot_dimension_numbers<[1], [0], [0], [1], [0, 0, 1, 1], [], []>} : vector<8x8xbf16>, vector<8x8xbf16>, vector<8x8xf32> -> vector<8x8xf32>
    %c0_33 = arith.constant 0 : index
    %c16 = arith.constant 16 : index
    %78 = vector.load %arg19[%c0_33, %c16] : memref<8x32xf32, #tpu.memory_space<vmem>>, vector<8x8xf32>
    tpu.vector_store %arg19[%c0_33, %c16], %77 {strides = array<i32>} : memref<8x32xf32, #tpu.memory_space<vmem>>, vector<8x8xf32>,
    %79 = vector.extract_strided_slice %25 {offsets = [0, 24], sizes = [8, 8], strides = [1, 1]} : vector<8x32xbf16> to vector<8x8xbf16>
    %80 = vector.extract_strided_slice %26 {offsets = [0, 24], sizes = [8, 8], strides = [1, 1]} : vector<8x32xbf16> to vector<8x8xbf16>
    %81 = vector.extract_strided_slice %27 {offsets = [0, 24], sizes = [8, 8], strides = [1, 1]} : vector<8x32xbf16> to vector<8x8xbf16>
    %cst_34 = arith.constant dense<0.000000e+00> : vector<8x8xf32>
    %82 = tpu.matmul %79, %80, %cst_34 {dimension_numbers = #tpu.dot_dimension_numbers<[1], [1], [0], [0], [0, 0, 1, 0], [], []>} : vector<8x8xbf16>, vector<8x8xbf16>, vector<8x8xf32> -> vector<8x8xf32>
    %83 = arith.addf %82, %9 : vector<8x8xf32>
    %cst_35 = arith.constant dense<0xFF800000> : vector<8xf32>
    %84 = vector.multi_reduction <maximumf>, %83, %cst_35 [1] : vector<8x8xf32> to vector<8xf32>
    %85 = vector.shape_cast %84 : vector<8xf32> to vector<8x1xf32>
    %86 = vector.broadcast %85 : vector<8x1xf32> to vector<8x8xf32>
    %87 = arith.subf %83, %86 : vector<8x8xf32>
    %88 = math.exp %87 : vector<8x8xf32>
    %cst_36 = arith.constant dense<0.000000e+00> : vector<8xf32>
    %89 = vector.multi_reduction <add>, %88, %cst_36 [1] : vector<8x8xf32> to vector<8xf32>
    %90 = vector.shape_cast %89 : vector<8xf32> to vector<8x1xf32>
    %91 = vector.broadcast %90 : vector<8x1xf32> to vector<8x8xf32>
    %92 = arith.divf %88, %91 : vector<8x8xf32>
    %93 = arith.truncf %92 : vector<8x8xf32> to vector<8x8xbf16>
    %cst_37 = arith.constant dense<0.000000e+00> : vector<8x8xf32>
    %94 = tpu.matmul %93, %81, %cst_37 {dimension_numbers = #tpu.dot_dimension_numbers<[1], [0], [0], [1], [0, 0, 1, 1], [], []>} : vector<8x8xbf16>, vector<8x8xbf16>, vector<8x8xf32> -> vector<8x8xf32>
    %c0_38 = arith.constant 0 : index
    %c24 = arith.constant 24 : index
    %95 = vector.load %arg19[%c0_38, %c24] : memref<8x32xf32, #tpu.memory_space<vmem>>, vector<8x8xf32>
    tpu.vector_store %arg19[%c0_38, %c24], %94 {strides = array<i32>} : memref<8x32xf32, #tpu.memory_space<vmem>>, vector<8x8xf32>,
    %c0_39 = arith.constant 0 : index
    %c0_40 = arith.constant 0 : index
    %96 = vector.load %arg19[%c0_39, %c0_40] : memref<8x32xf32, #tpu.memory_space<vmem>>, vector<8x32xf32>
    %97 = arith.truncf %96 : vector<8x32xf32> to vector<8x32xbf16>
    %c0_41 = arith.constant 0 : index
    %c0_42 = arith.constant 0 : index
    %c0_43 = arith.constant 0 : index
    %98 = vector.load %arg8[%c0_41, %c0_42, %c0_43] : memref<1x32x32xbf16, #tpu.memory_space<vmem>>, vector<1x32x32xbf16>
    %99 = vector.shape_cast %98 : vector<1x32x32xbf16> to vector<32x32xbf16>
    %cst_44 = arith.constant dense<0.000000e+00> : vector<8x32xf32>
    %100 = tpu.matmul %97, %99, %cst_44 {dimension_numbers = #tpu.dot_dimension_numbers<[1], [0], [0], [1], [0, 0, 1, 1], [], []>} : vector<8x32xbf16>, vector<32x32xbf16>, vector<8x32xf32> -> vector<8x32xf32>
    %101 = arith.addf %5, %100 : vector<8x32xf32>
    %c0_45 = arith.constant 0 : index
    %c0_46 = arith.constant 0 : index
    %c0_47 = arith.constant 0 : index
    %102 = vector.load %arg13[%c0_45, %c0_46, %c0_47] : memref<1x1x32xf32, #tpu.memory_space<vmem>>, vector<1x1x32xf32>
    %103 = vector.shape_cast %102 : vector<1x1x32xf32> to vector<1x32xf32>
    %c0_48 = arith.constant 0 : index
    %c0_49 = arith.constant 0 : index
    %c0_50 = arith.constant 0 : index
    %104 = vector.load %arg14[%c0_48, %c0_49, %c0_50] : memref<1x1x32xf32, #tpu.memory_space<vmem>>, vector<1x1x32xf32>
    %105 = vector.shape_cast %104 : vector<1x1x32xf32> to vector<1x32xf32>
    %cst_51 = arith.constant dense<0.000000e+00> : vector<8xf32>
    %106 = vector.multi_reduction <add>, %101, %cst_51 [1] : vector<8x32xf32> to vector<8xf32>
    %107 = vector.shape_cast %106 : vector<8xf32> to vector<8x1xf32>
    %cst_52 = arith.constant 3.200000e+01 : f32
    %108 = vector.broadcast %cst_52 : f32 to vector<8x1xf32>
    %109 = arith.divf %107, %108 : vector<8x1xf32>
    %110 = vector.broadcast %109 : vector<8x1xf32> to vector<8x32xf32>
    %111 = arith.subf %101, %110 : vector<8x32xf32>
    %112 = arith.mulf %111, %111 : vector<8x32xf32>
    %cst_53 = arith.constant dense<0.000000e+00> : vector<8xf32>
    %113 = vector.multi_reduction <add>, %112, %cst_53 [1] : vector<8x32xf32> to vector<8xf32>
    %114 = vector.shape_cast %113 : vector<8xf32> to vector<8x1xf32>
    %cst_54 = arith.constant 3.200000e+01 : f32
    %115 = vector.broadcast %cst_54 : f32 to vector<8x1xf32>
    %116 = arith.divf %114, %115 : vector<8x1xf32>
    %117 = vector.broadcast %109 : vector<8x1xf32> to vector<8x32xf32>
    %118 = arith.subf %101, %117 : vector<8x32xf32>
    %cst_55 = arith.constant 9.99999974E-6 : f32
    %119 = vector.broadcast %cst_55 : f32 to vector<8x1xf32>
    %120 = arith.addf %116, %119 : vector<8x1xf32>
    %121 = math.rsqrt %120 : vector<8x1xf32>
    %122 = vector.broadcast %121 : vector<8x1xf32> to vector<8x32xf32>
    %123 = arith.mulf %118, %122 : vector<8x32xf32>
    %124 = vector.broadcast %103 : vector<1x32xf32> to vector<8x32xf32>
    %125 = arith.mulf %123, %124 : vector<8x32xf32>
    %126 = vector.broadcast %105 : vector<1x32xf32> to vector<8x32xf32>
    %127 = arith.addf %125, %126 : vector<8x32xf32>
    %128 = arith.truncf %127 : vector<8x32xf32> to vector<8x32xbf16>
    %c0_56 = arith.constant 0 : index
    %c0_57 = arith.constant 0 : index
    %c0_58 = arith.constant 0 : index
    %129 = vector.load %arg9[%c0_56, %c0_57, %c0_58] : memref<1x32x64xbf16, #tpu.memory_space<vmem>>, vector<1x32x64xbf16>
    %130 = vector.shape_cast %129 : vector<1x32x64xbf16> to vector<32x64xbf16>
    %cst_59 = arith.constant dense<0.000000e+00> : vector<8x64xf32>
    %131 = tpu.matmul %128, %130, %cst_59 {dimension_numbers = #tpu.dot_dimension_numbers<[1], [0], [0], [1], [0, 0, 1, 1], [], []>} : vector<8x32xbf16>, vector<32x64xbf16>, vector<8x64xf32> -> vector<8x64xf32>
    %c0_60 = arith.constant 0 : index
    %c0_61 = arith.constant 0 : index
    %c0_62 = arith.constant 0 : index
    %132 = vector.load %arg10[%c0_60, %c0_61, %c0_62] : memref<1x1x64xf32, #tpu.memory_space<vmem>>, vector<1x1x64xf32>
    %133 = vector.shape_cast %132 : vector<1x1x64xf32> to vector<1x64xf32>
    %134 = vector.broadcast %133 : vector<1x64xf32> to vector<8x64xf32>
    %135 = arith.addf %131, %134 : vector<8x64xf32>
    %cst_63 = arith.constant 0.000000e+00 : f32
    %136 = vector.broadcast %cst_63 : f32 to vector<8x64xf32>
    %137 = arith.maximumf %135, %136 : vector<8x64xf32>
    %138 = arith.truncf %137 : vector<8x64xf32> to vector<8x64xbf16>
    %c0_64 = arith.constant 0 : index
    %c0_65 = arith.constant 0 : index
    %c0_66 = arith.constant 0 : index
    %139 = vector.load %arg11[%c0_64, %c0_65, %c0_66] : memref<1x64x32xbf16, #tpu.memory_space<vmem>>, vector<1x64x32xbf16>
    %140 = vector.shape_cast %139 : vector<1x64x32xbf16> to vector<64x32xbf16>
    %cst_67 = arith.constant dense<0.000000e+00> : vector<8x32xf32>
    %141 = tpu.matmul %138, %140, %cst_67 {dimension_numbers = #tpu.dot_dimension_numbers<[1], [0], [0], [1], [0, 0, 1, 1], [], []>} : vector<8x64xbf16>, vector<64x32xbf16>, vector<8x32xf32> -> vector<8x32xf32>
    %c0_68 = arith.constant 0 : index
    %c0_69 = arith.constant 0 : index
    %c0_70 = arith.constant 0 : index
    %142 = vector.load %arg12[%c0_68, %c0_69, %c0_70] : memref<1x1x32xf32, #tpu.memory_space<vmem>>, vector<1x1x32xf32>
    %143 = vector.shape_cast %142 : vector<1x1x32xf32> to vector<1x32xf32>
    %144 = vector.broadcast %143 : vector<1x32xf32> to vector<8x32xf32>
    %145 = arith.addf %141, %144 : vector<8x32xf32>
    %146 = arith.addf %127, %145 : vector<8x32xf32>
    %c0_71 = arith.constant 0 : index
    %c0_72 = arith.constant 0 : index
    %c0_73 = arith.constant 0 : index
    %147 = vector.load %arg15[%c0_71, %c0_72, %c0_73] : memref<1x1x32xf32, #tpu.memory_space<vmem>>, vector<1x1x32xf32>
    %148 = vector.shape_cast %147 : vector<1x1x32xf32> to vector<1x32xf32>
    %c0_74 = arith.constant 0 : index
    %c0_75 = arith.constant 0 : index
    %c0_76 = arith.constant 0 : index
    %149 = vector.load %arg16[%c0_74, %c0_75, %c0_76] : memref<1x1x32xf32, #tpu.memory_space<vmem>>, vector<1x1x32xf32>
    %150 = vector.shape_cast %149 : vector<1x1x32xf32> to vector<1x32xf32>
    %cst_77 = arith.constant dense<0.000000e+00> : vector<8xf32>
    %151 = vector.multi_reduction <add>, %146, %cst_77 [1] : vector<8x32xf32> to vector<8xf32>
    %152 = vector.shape_cast %151 : vector<8xf32> to vector<8x1xf32>
    %cst_78 = arith.constant 3.200000e+01 : f32
    %153 = vector.broadcast %cst_78 : f32 to vector<8x1xf32>
    %154 = arith.divf %152, %153 : vector<8x1xf32>
    %155 = vector.broadcast %154 : vector<8x1xf32> to vector<8x32xf32>
    %156 = arith.subf %146, %155 : vector<8x32xf32>
    %157 = arith.mulf %156, %156 : vector<8x32xf32>
    %cst_79 = arith.constant dense<0.000000e+00> : vector<8xf32>
    %158 = vector.multi_reduction <add>, %157, %cst_79 [1] : vector<8x32xf32> to vector<8xf32>
    %159 = vector.shape_cast %158 : vector<8xf32> to vector<8x1xf32>
    %cst_80 = arith.constant 3.200000e+01 : f32
    %160 = vector.broadcast %cst_80 : f32 to vector<8x1xf32>
    %161 = arith.divf %159, %160 : vector<8x1xf32>
    %162 = vector.broadcast %154 : vector<8x1xf32> to vector<8x32xf32>
    %163 = arith.subf %146, %162 : vector<8x32xf32>
    %cst_81 = arith.constant 9.99999974E-6 : f32
    %164 = vector.broadcast %cst_81 : f32 to vector<8x1xf32>
    %165 = arith.addf %161, %164 : vector<8x1xf32>
    %166 = math.rsqrt %165 : vector<8x1xf32>
    %167 = vector.broadcast %166 : vector<8x1xf32> to vector<8x32xf32>
    %168 = arith.mulf %163, %167 : vector<8x32xf32>
    %169 = vector.broadcast %148 : vector<1x32xf32> to vector<8x32xf32>
    %170 = arith.mulf %168, %169 : vector<8x32xf32>
    %171 = vector.broadcast %150 : vector<1x32xf32> to vector<8x32xf32>
    %172 = arith.addf %170, %171 : vector<8x32xf32>
    %173 = vector.broadcast %8 : vector<8x1xf32> to vector<8x32xf32>
    %174 = arith.mulf %172, %173 : vector<8x32xf32>
    %175 = arith.index_cast %arg1 : i32 to index
    %c0_82 = arith.constant 0 : index
    %c0_83 = arith.constant 0 : index
    %176 = vector.load %arg18[%175, %c0_82, %c0_83] : memref<2x8x32xf32, #tpu.memory_space<vmem>>, vector<1x8x32xf32>
    %177 = vector.shape_cast %176 : vector<1x8x32xf32> to vector<8x32xf32>
    %178 = vector.shape_cast %174 : vector<8x32xf32> to vector<1x8x32xf32>
    tpu.vector_store %arg18[%175, %c0_82, %c0_83], %178 {strides = array<i32>} : memref<2x8x32xf32, #tpu.memory_space<vmem>>, vector<1x8x32xf32>,
    %c0_84 = arith.constant 0 : index
    %c0_85 = arith.constant 0 : index
    %c0_86 = arith.constant 0 : index
    %179 = vector.load %arg17[%c0_84, %c0_85, %c0_86] : memref<1x8x32xf32, #tpu.memory_space<vmem>>, vector<1x8x32xf32>
    %180 = vector.shape_cast %179 : vector<1x8x32xf32> to vector<8x32xf32>
    %181 = vector.shape_cast %174 : vector<8x32xf32> to vector<1x8x32xf32>
    tpu.vector_store %arg17[%c0_84, %c0_85, %c0_86], %181 {strides = array<i32>} : memref<1x8x32xf32, #tpu.memory_space<vmem>>, vector<1x8x32xf32>,
    return
  }
  func.func @transform_0(%arg0: i32, %arg1: i32) -> (i32, i32, i32) {
    %c0_i32 = arith.constant 0 : i32
    %c0_i32_0 = arith.constant 0 : i32
    %c0_i32_1 = arith.constant 0 : i32
    %c0_i32_2 = arith.constant 0 : i32
    return %c0_i32, %c0_i32_0, %c0_i32_1 : i32, i32, i32
  }
  func.func @transform_1(%arg0: i32, %arg1: i32) -> (i32, i32, i32) {
    %c0_i32 = arith.constant 0 : i32
    %c0_i32_0 = arith.constant 0 : i32
    %c0_i32_1 = arith.constant 0 : i32
    %c0_i32_2 = arith.constant 0 : i32
    return %c0_i32, %c0_i32_0, %c0_i32_1 : i32, i32, i32
  }
  func.func @transform_2(%arg0: i32, %arg1: i32) -> (i32, i32) {
    %c0_i32 = arith.constant 0 : i32
    %c0_i32_0 = arith.constant 0 : i32
    %c0_i32_1 = arith.constant 0 : i32
    return %c0_i32, %c0_i32_0 : i32, i32
  }
  func.func @transform_3(%arg0: i32, %arg1: i32) -> (i32, i32, i32) {
    %c0_i32 = arith.constant 0 : i32
    %c0_i32_0 = arith.constant 0 : i32
    %c0_i32_1 = arith.constant 0 : i32
    return %arg0, %c0_i32, %c0_i32_0 : i32, i32, i32
  }
  func.func @transform_4(%arg0: i32, %arg1: i32) -> (i32, i32, i32) {
    %c0_i32 = arith.constant 0 : i32
    %c0_i32_0 = arith.constant 0 : i32
    %c0_i32_1 = arith.constant 0 : i32
    return %arg0, %c0_i32, %c0_i32_0 : i32, i32, i32
  }
  func.func @transform_5(%arg0: i32, %arg1: i32) -> (i32, i32, i32) {
    %c0_i32 = arith.constant 0 : i32
    %c0_i32_0 = arith.constant 0 : i32
    %c0_i32_1 = arith.constant 0 : i32
    return %arg0, %c0_i32, %c0_i32_0 : i32, i32, i32
  }
  func.func @transform_6(%arg0: i32, %arg1: i32) -> (i32, i32, i32) {
    %c0_i32 = arith.constant 0 : i32
    %c0_i32_0 = arith.constant 0 : i32
    %c0_i32_1 = arith.constant 0 : i32
    return %arg0, %c0_i32, %c0_i32_0 : i32, i32, i32
  }
  func.func @transform_7(%arg0: i32, %arg1: i32) -> (i32, i32, i32) {
    %c0_i32 = arith.constant 0 : i32
    %c0_i32_0 = arith.constant 0 : i32
    %c0_i32_1 = arith.constant 0 : i32
    return %arg0, %c0_i32, %c0_i32_0 : i32, i32, i32
  }
  func.func @transform_8(%arg0: i32, %arg1: i32) -> (i32, i32, i32) {
    %c0_i32 = arith.constant 0 : i32
    %c0_i32_0 = arith.constant 0 : i32
    %c0_i32_1 = arith.constant 0 : i32
    return %arg0, %c0_i32, %c0_i32_0 : i32, i32, i32
  }
  func.func @transform_9(%arg0: i32, %arg1: i32) -> (i32, i32, i32) {
    %c0_i32 = arith.constant 0 : i32
    %c0_i32_0 = arith.constant 0 : i32
    %c0_i32_1 = arith.constant 0 : i32
    return %arg0, %c0_i32, %c0_i32_0 : i32, i32, i32
  }
  func.func @transform_10(%arg0: i32, %arg1: i32) -> (i32, i32, i32) {
    %c0_i32 = arith.constant 0 : i32
    %c0_i32_0 = arith.constant 0 : i32
    %c0_i32_1 = arith.constant 0 : i32
    return %arg0, %c0_i32, %c0_i32_0 : i32, i32, i32
  }
  func.func @transform_11(%arg0: i32, %arg1: i32) -> (i32, i32, i32) {
    %c0_i32 = arith.constant 0 : i32
    %c0_i32_0 = arith.constant 0 : i32
    %c0_i32_1 = arith.constant 0 : i32
    return %arg0, %c0_i32, %c0_i32_0 : i32, i32, i32
  }
  func.func @transform_12(%arg0: i32, %arg1: i32) -> (i32, i32, i32) {
    %c0_i32 = arith.constant 0 : i32
    %c0_i32_0 = arith.constant 0 : i32
    %c0_i32_1 = arith.constant 0 : i32
    return %arg0, %c0_i32, %c0_i32_0 : i32, i32, i32
  }
  func.func @transform_13(%arg0: i32, %arg1: i32) -> (i32, i32, i32) {
    %c0_i32 = arith.constant 0 : i32
    %c0_i32_0 = arith.constant 0 : i32
    %c0_i32_1 = arith.constant 0 : i32
    return %arg0, %c0_i32, %c0_i32_0 : i32, i32, i32
  }
  func.func @transform_14(%arg0: i32, %arg1: i32) -> (i32, i32, i32) {
    %c0_i32 = arith.constant 0 : i32
    %c0_i32_0 = arith.constant 0 : i32
    %c0_i32_1 = arith.constant 0 : i32
    return %arg0, %c0_i32, %c0_i32_0 : i32, i32, i32
  }
  func.func @transform_15(%arg0: i32, %arg1: i32) -> (i32, i32, i32) {
    %c0_i32 = arith.constant 0 : i32
    %c0_i32_0 = arith.constant 0 : i32
    %c0_i32_1 = arith.constant 0 : i32
    return %arg1, %c0_i32, %c0_i32_0 : i32, i32, i32
  }
}

</mosaic_0001>

<bundles_post_ra>
// kernel: tpu_custom_call.1
= control target key start
LH: loop header
LB: loop body
LE: loop exit
PB: predicated region body
PF: predicated region fallthrough
CT: control target
= control target key end

     0   :  { %s3215_s0 = inlined_call_operand.hbm [shape: f32[2,8,32], index: 0, kind: input, shape index: {}]   ;;  %s3216_s1 = inlined_call_operand.vmem [shape: f32[2,8,1], index: 1, kind: input, shape index: {}]   ;;  %s3217_s2 = inlined_call_operand.hbm [shape: f32[8,8], index: 2, kind: input, shape index: {}]   ;;  %s3218_s3 = inlined_call_operand.vmem [shape: bf16[2,32,32], index: 3, kind: input, shape index: {}]   ;;  %s3219_s4 = inlined_call_operand.vmem [shape: bf16[2,32,32], index: 4, kind: input, shape index: {}]   ;;  %s3220_s5 = inlined_call_operand.vmem [shape: bf16[2,32,32], index: 5, kind: input, shape index: {}]   ;;  %s3221_s6 = inlined_call_operand.hbm [shape: bf16[2,32,32], index: 6, kind: input, shape index: {}]   ;;  %s3222_s7 = inlined_call_operand.hbm [shape: bf16[2,32,64], index: 7, kind: input, shape index: {}]   ;;  %s3223_s8 = inlined_call_operand.vmem [shape: f32[2,1,64], index: 8, kind: input, shape index: {}]   ;;  %s3224_s9 = inlined_call_operand.vmem [shape: bf16[2,64,32], index: 9, kind: input, shape index: {}]   ;;  %s3225_s10 = inlined_call_operand.vmem [shape: f32[2,1,32], index: 10, kind: input, shape index: {}]   ;;  %s3226_s11 = inlined_call_operand.vmem [shape: f32[2,1,32], index: 11, kind: input, shape index: {}]   ;;  %s3227_s12 = inlined_call_operand.hbm [shape: f32[2,1,32], index: 12, kind: input, shape index: {}]   ;;  %s3228_s13 = inlined_call_operand.vmem [shape: f32[2,1,32], index: 13, kind: input, shape index: {}]   ;;  %s3229_s14 = inlined_call_operand.vmem [shape: f32[2,1,32], index: 14, kind: input, shape index: {}]   ;;  %s3230_s15 = inlined_call_operand.hbm [shape: f32[2,8,32], index: 15, kind: output, shape index: {}]  }
   0x1   :  { %3252 = sst [smem:[#allocation32_spill]] %s3215_s0 }
   0x2   :  { %3253 = sst [smem:[#allocation33_spill]] %s3216_s1 }
   0x3   :  { %3254 = sst [smem:[#allocation34_spill]] %s3217_s2 }
   0x4   :  { %3255 = sst [smem:[#allocation35_spill]] %s3218_s3 }
   0x5   :  { %3256 = sst [smem:[#allocation36_spill]] %s3219_s4 }
   0x6   :  { %3257 = sst [smem:[#allocation37_spill]] %s3220_s5 }
   0x7   :  { %3258 = sst [smem:[#allocation38_spill]] %s3221_s6 }
   0x8   :  { %3259 = sst [smem:[#allocation39_spill]] %s3222_s7 }
   0x9   :  { %3260 = sst [smem:[#allocation40_spill]] %s3224_s9 }
   0xa   :  { %3261 = sst [smem:[#allocation41_spill]] %s3225_s10 }
   0xb   :  { %3262 = sst [smem:[#allocation42_spill]] %s3226_s11 }
   0xc   :  { %3263 = sst [smem:[#allocation43_spill]] %s3227_s12 }
   0xd   :  { %3264 = sst [smem:[#allocation44_spill]] %s3228_s13 }
   0xe   :  { %3265 = sst [smem:[#allocation45_spill]] %s3229_s14 }
   0xf   :  { %3266 = sst [smem:[#allocation46_spill]] %s3230_s15 }
  0x10   :  { %20 = vsyncpa [#allocation5], 0 }
  0x11   :  { %21 = vsyncpa [#allocation8], 0 }
  0x12   :  { %22 = vsyncpa [#allocation6], 0 }
  0x13   :  { %24 = vsyncpa [#allocation6 + $0x1], 0  ;;  %s2715_s18 = smov 0   ;;  %s2717_s19 = smov 0  }
  0x14   :  { %s2719_s20 = smov 0   ;;  %s2721_s21 = smov 0  }
  0x15   :  { %s2723_s22 = smov 0   ;;  %s2725_s23 = smov 0  }
  0x16   :  { %s2727_s24 = smov 0   ;;  %s2729_s25 = smov 0  }
  0x17   :  { %s2731_s26 = smov 0   ;;  %s2733_s27 = smov 0  }
  0x18   :  { %s2735_s28 = smov 0  }
  0x19 LB: > { %3267 = sst [smem:[#allocation17_spill]] %s2574_s18  ;;  %s2769_s29 = sadd.s32 4294967295, %s2614_s28   ;;  %s2614_s28 = sphi %s2735_s28, %s30_s28   ;;  %s2610_s27 = sphi %s2733_s27, %s3339_s27   ;;  %s2606_s26 = sphi %s2731_s26, %s3338_s26   ;;  %s2602_s25 = sphi %s2729_s25, %s3337_s25   ;;  %s2598_s24 = sphi %s2727_s24, %s3336_s24   ;;  %s2594_s23 = sphi %s2725_s23, %s3335_s23   ;;  %s2590_s22 = sphi %s2723_s22, %s3334_s22   ;;  %s2586_s21 = sphi %s2721_s21, %s3333_s21   ;;  %s2582_s20 = sphi %s2719_s20, %s3332_s20   ;;  %s2578_s19 = sphi %s2717_s19, %s3331_s19   ;;  %s2574_s18 = sphi %s2715_s18, %s3330_s18  }
  0x1a   : > { %3268 = sst [smem:[#allocation18_spill]] %s2578_s19  ;;  %s1960_s30 = sadd.s32 4294967294, %s2614_s28  }
  0x1b   : > { %3269 = sst [smem:[#allocation19_spill]] %s2582_s20  ;;  %s39_s16 = sadd.s32 1, %s2606_s26 }
  0x1c   : > { %3270 = sst [smem:[#allocation20_spill]] %s2590_s22  ;;  %p2774_p0 = scmp.ge.s32.totalorder %s39_s16, 2 }
  0x1d   : > { %3271 = sst [smem:[#allocation21_spill]] %s2594_s23  ;;  %p197_p1 = scmp.ne.s32.totalorder %s2594_s23, %s2590_s22 }
  0x1e   : > { %3272 = sst [smem:[#allocation22_spill]] %s2598_s24  ;;  %p198_p2 = scmp.eq.s32.totalorder %s2614_s28, 0 }
  0x1f   : > { %3273 = sst [smem:[#allocation23_spill]] %s2606_s26  ;;  %p203_p3 = scmp.ne.s32.totalorder %s2590_s22, %s2586_s21 }
  0x20   : > { %3274 = sst [smem:[#allocation24_spill]] %s2610_s27  ;;  %s3341_s16 = smov (%p2774_p0, %s39_s16), 0 }
  0x21   : > { %3275 = sst [smem:[#allocation25_spill]] %s2614_s28  ;;  %p2786_p4 = por %p198_p2, %p197_p1 }
  0x22   : > { %3277 = sst [smem:[#allocation26_spill]] %s3341_s16  ;;  %p3236_p5 = scmp.eq.s32.totalorder %s2769_s29, 0 }
  0x23   : > { %s421_s17 = ssub.s32 %s2606_s26, %s3341_s16  ;;  %s424_s24 = sadd.s32 1, %s2582_s20 }
  0x24   : > { %p2796_p6 = por %p3236_p5, %p203_p3  ;;  %p422_p7 = scmp.eq.s32.totalorder %s421_s17, 0 }
  0x25   : > { %p434_p8 = scmp.ne.s32.totalorder %s2582_s20, %s2578_s19  ;;  %p435_p9 = scmp.eq.s32.totalorder %s2769_s29, 3 }
  0x26   : > { %s3279_s14 = scalar_select %p2796_p6, 1, 0 }
  0x27   : > { %s2804_s21 = scalar_select %p422_p7, %s2582_s20, %s424_s24  }
  0x28   : > { %p2806_p10 = por %p435_p9, %p434_p8  ;;  %p440_p11 = scmp.ne.s32.totalorder %s2578_s19, %s2574_s18 }
  0x29   : > { %3280 = sst [smem:[#allocation27_spill]] %s2804_s21  ;;  %p441_p12 = scmp.eq.s32.totalorder %s1960_s30, 3 }
  0x2a   : > { %s3281_s13 = scalar_select %p2806_p10, 1, 0 }
  0x2b   : > { %p1961_p13 = scmp.ge.s32.totalorder %s2614_s28, 1  ;;  %p448_p1 = scmp.lt.s32.totalorder %s2614_s28, 5 }
  0x2c   : > { %3282 = sst [smem:[#allocation28_spill]] %s3281_s13  ;;  %p2814_p2 = por %p441_p12, %p440_p11 }
  0x2d   : > { %p2818_p3 = pnand %p1961_p13, %p448_p1  ;;  %s2616_s26 = smov [#allocation4]  }
  0x2e   : > { %s3283_s16 = scalar_select %p2814_p2, 1, 0 }
  0x2f   : > { %s460_s24 = sshll.u32 %s2616_s26, 4  ;;  %p2185_p7 = pneg %p2818_p3  ;;  %s461_s24 = int_to_ptr.vmem [resolvable:$true] %s460_s24 }
  0x30   : > { %3284 = sst [smem:[#allocation29_spill]] %s3283_s16  ;;  %p2208_p8 = scmp.lt.s32.totalorder %s2614_s28, 4 }
  0x31   : > { %p2827_p9 = pnand %p2185_p7, %p3236_p5  ;;  %s42_s20 = sadd.s32 1, %s2610_s27 }
  0x32   : > { %p2833_p11 = pnand %p2208_p8, %p2786_p4  ;;  %s2361_s26 = scalar_lea.vmem %s461_s24, 256 }
  0x33   : > { %p2352_p12 = pneg %p2827_p9  ;;  %p2362_p13 = scmp.ne.s32.totalorder %s461_s24, %s2361_s26 }
  0x34   : > { %p2369_p7 = scmp.lt.s32.totalorder %s461_s24, %s461_s24  ;;  %p2370_p5 = scmp.lt.s32.totalorder %s2361_s26, %s2361_s26 }
  0x35   : > { %p2364_p1 = pnand %p2362_p13, %p2352_p12 }
  0x36   : > { %p2371_p10 = por %p2370_p5, %p2369_p7 }
  0x37   : > { %p2365_p2 = pneg %p2364_p1 }
  0x39   : > { %p2372_p6 = pnand %p2371_p10, %p2365_p2 }
  0x3b   : > { %2375 = shalt.err (!%p2372_p6)
}
  0x3c   : > { %s2617_s1 = smov 128   ;;  %s2618_s16 = smov 8  }
  0x3d   : > { %s3288_s0 = sld [smem:[#allocation32_spill]]  ;;  %s512_s26 = sand.u32 1, %s2614_s28  }
  0x3e   : > { %s3343_s20 = smov (!%p2774_p0, %s42_s20), %s2610_s27  ;;  %s3243_s11 = sand.u32 1, %s2594_s23  }
  0x3f   : > { %p44_p4 = scmp.ge.s32.totalorder %s3343_s20, 2  ;;  %s2855_s10 = sshll.u32 %s3243_s11, 4 }
  0x40   : > { %s2027_s9 = sshll.u32 %s2610_s27, 8  ;;  %s3290_s6 = sld [smem:[#allocation38_spill]] }
  0x41   : > { %s3345_s20 = smov (%p44_p4, %s3343_s20), 0  ;;  %s516_s18 = scalar_lea.vmem [#allocation9], %s2855_s10 }
  0x42   : > { %3289 = sst [smem:[#allocation30_spill]] %s3345_s20  ;;  %s187_s15 = ssub.s32 %s2610_s27, %s3345_s20 }
  0x43   : > { %2188 = dma.hbm_to_vmem [thread:$0]  (!%p2827_p9), %s3288_s0, 256, %s461_s24, [#allocation5], %s2617_s1, %s2617_s1, %s2618_s16  }
  0x44   : > { %s523_s16 = sshll.u32 %s516_s18, 4  ;;  %p188_p0 = scmp.eq.s32.totalorder %s187_s15, 0  ;;  %s524_s16 = int_to_ptr.vmem [resolvable:$true] %s523_s16 }
  0x45   : > { %s3291_s24 = sadd.s32 1, %s2594_s23  ;;  %s2873_s11 = scalar_lea.sflag [#allocation5], %s512_s26 }
  0x46   : > { %s522_s13 = scalar_lea.hbm %s3290_s6, %s2027_s9  ;;  %p2378_p5 = pneg %p2833_p11 }
  0x47   : > { %s2871_s1 = scalar_select %p188_p0, %s2594_s23, %s3291_s24  }
  0x48   : > { %s2389_s0 = scalar_lea.vmem %s524_s16, 256  ;;  %s2619_s4 = smov [#allocation9]  }
  0x49   : > { %3292 = sst [smem:[#allocation31_spill]] %s2871_s1  ;;  %p2390_p6 = scmp.ne.s32.totalorder %s524_s16, %s2389_s0 }
  0x4a   : > { %s2394_s5 = sshll.u32 %s2619_s4, 4  ;;  %s2395_s5 = int_to_ptr.vmem [resolvable:$false] %s2394_s5 }
  0x4b   : > { %p2392_p10 = pnand %p2390_p6, %p2378_p5  ;;  %s2396_s18 = scalar_lea.vmem %s2395_s5, 512 }
  0x4c   : > { %p2397_p8 = scmp.lt.s32.totalorder %s524_s16, %s2395_s5  ;;  %p2398_p13 = scmp.lt.s32.totalorder %s2396_s18, %s2389_s0 }
  0x4d   : > { %p2393_p2 = pneg %p2392_p10 }
  0x4e   : > { %p2399_p1 = por %p2398_p13, %p2397_p8 }
  0x50   : > { %p2400_p7 = pnand %p2399_p1, %p2393_p2 }
  0x52   : > { %2403 = shalt.err (!%p2400_p7)
}
  0x53   : > { %s2620_s15 = smov 64   ;;  %s2621_s26 = smov 4  }
  0x54   : > { %2195 = dma.hbm_to_vmem [thread:$0]  (!%p2833_p11), %s522_s13, 256, %s524_s16, %s2873_s11, %s2620_s15, %s2620_s15, %s2621_s26  }
  0x55   : > { %s3293_s7 = sld [smem:[#allocation39_spill]]  ;;  %s537_s20 = scalar_lea.vmem [#allocation10], %s2855_s10 }
  0x56   : > { %s544_s5 = sshll.u32 %s537_s20, 4  ;;  %s2622_s18 = smov [#allocation10]   ;;  %s545_s5 = int_to_ptr.vmem [resolvable:$true] %s544_s5 }
  0x57   : > { %s2417_s0 = scalar_lea.vmem %s545_s5, 256  ;;  %s2422_s1 = sshll.u32 %s2622_s18, 4  ;;  %s2423_s1 = int_to_ptr.vmem [resolvable:$false] %s2422_s1 }
  0x58   : > { %p2418_p4 = scmp.ne.s32.totalorder %s545_s5, %s2417_s0  ;;  %s2424_s28 = scalar_lea.vmem %s2423_s1, 512 }
  0x59   : > { %p2425_p10 = scmp.lt.s32.totalorder %s545_s5, %s2423_s1  ;;  %p2426_p2 = scmp.lt.s32.totalorder %s2424_s28, %s2417_s0 }
  0x5a   : > { %p2420_p0 = pnand %p2418_p4, %p2378_p5 }
  0x5b   : > { %s543_s4 = scalar_lea.hbm %s3293_s7, %s2027_s9  ;;  %p2427_p8 = por %p2426_p2, %p2425_p10 }
  0x5c   : > { %p2421_p6 = pneg %p2420_p0 }
  0x5e   : > { %p2428_p13 = pnand %p2427_p8, %p2421_p6 }
  0x60   : > { %2431 = shalt.err (!%p2428_p13)
}
  0x61   : > { %2198 = dma.hbm_to_vmem [thread:$0]  (!%p2833_p11), %s543_s4, 256, %s545_s5, %s2873_s11, %s2620_s15, %s2620_s15, %s2621_s26  }
  0x62   : > { %s2623_s6 = smov [#allocation7]   ;;  %s1971_s10 = sshll.u32 %s2610_s27, 4 }
  0x63   : > { %s477_s9 = sshll.u32 %s2623_s6, 4  ;;  %s478_s9 = int_to_ptr.vmem [resolvable:$true] %s477_s9 }
  0x64   : > { %s2443_s20 = scalar_lea.vmem %s478_s9, 128  ;;  %p2451_p0 = scmp.lt.s32.totalorder %s478_s9, %s478_s9 }
  0x65   : > { %p2444_p1 = scmp.ne.s32.totalorder %s478_s9, %s2443_s20  ;;  %p2452_p10 = scmp.lt.s32.totalorder %s2443_s20, %s2443_s20 }
  0x67   : > { %p2446_p7 = pnand %p2444_p1, %p2352_p12  ;;  %p2453_p6 = por %p2452_p10, %p2451_p0 }
  0x69   : > { %p2447_p4 = pneg %p2446_p7 }
  0x6b   : > { %p2454_p2 = pnand %p2453_p6, %p2447_p4 }
  0x6d   : > { %2457 = shalt.err (!%p2454_p2)
}
  0x6e   : > { %s3294_s2 = sld [smem:[#allocation34_spill]]  ;;  %s3296_s26 = sand.u32 1, %s2594_s23  }
  0x6f   : > { %s3295_s12 = sld [smem:[#allocation43_spill]]  ;;  %s583_s24 = scalar_lea.vmem [#allocation11], %s3296_s26 }
  0x70   : > { %s590_s4 = sshll.u32 %s583_s24, 4  ;;  %s2624_s30 = smov [#allocation11]   ;;  %s591_s4 = int_to_ptr.vmem [resolvable:$true] %s590_s4 }
  0x71   : > { %s2471_s5 = scalar_lea.vmem %s591_s4, 16  ;;  %s2476_s0 = sshll.u32 %s2624_s30, 4  ;;  %s2477_s0 = int_to_ptr.vmem [resolvable:$false] %s2476_s0 }
  0x72   : > { %p2472_p12 = scmp.ne.s32.totalorder %s591_s4, %s2471_s5  ;;  %s2478_s18 = scalar_lea.vmem %s2477_s0, 32 }
  0x73   : > { %p2479_p1 = scmp.lt.s32.totalorder %s591_s4, %s2477_s0 }
  0x74   : > { %2191 = dma.hbm_to_vmem [thread:$0]  (!%p2827_p9), %s3294_s2, 128, %s478_s9, [#allocation8]  }
  0x75   : > { %s588_s15 = scalar_lea.hbm %s3295_s12, %s1971_s10  ;;  %p2474_p8 = pnand %p2472_p12, %p2378_p5 }
  0x76   : > { %p2480_p9 = scmp.lt.s32.totalorder %s2478_s18, %s2471_s5 }
  0x77   : > { %p2475_p13 = pneg %p2474_p8 }
  0x78   : > { %p2481_p7 = por %p2480_p9, %p2479_p1 }
  0x7a   : > { %p2482_p4 = pnand %p2481_p7, %p2475_p13 }
  0x7c   : > { %2485 = shalt.err (!%p2482_p4)
}
  0x7d   : > { %2201 = dma.hbm_to_vmem [thread:$0]  (!%p2833_p11), %s588_s15, 16, %s591_s4, %s2873_s11  }
  0x7e   : > { %611 = sbr.rel (%p2818_p3) target bundleno = 2718 (0xa9e), region = 80  ;;  %p3297_p0 = scmp.eq.s32.totalorder (!%p2818_p3), %s2769_s29, 0 }
  0x83   : > { %2557 = dma.done.wait (%p3297_p0), [#allocation5], 256   ;;  %p3298_p5 = pmov %p3297_p0 }
  0x84   : > { %p3299_p10 = pmov %p3297_p0 }
  0x85   : > { %2559 = vsyncadd (%p3298_p5), [#allocation5], 4294967040 }
  0x86   : > { %2561 = dma.done.wait (%p3299_p10), [#allocation8], 128   ;;  %p3300_p6 = pmov %p3297_p0 }
  0x87   : > { %s621_s21 = sand.u32 1, %s2769_s29   ;;  %s623_s11 = sand.u32 1, %s2590_s22  }
  0x88   : > { %2563 = vsyncadd (%p3300_p6), [#allocation8], 4294967168  ;;  %s2927_s6 = sshll.u32 %s623_s11, 4  ;;  %s622_s17 = scalar_lea.sflag [#allocation5], %s621_s21 }
  0x89   : > { %p3301_p3 = scmp.ne.s32.totalorder %s3279_s14, 0 }
  0x8b   : > { %2565 = dma.done.wait (%p3301_p3), %s622_s17, 528  }
  0x8c   : > { %2567 = vsyncadd (%p3301_p3), %s622_s17, 4294966768  ;;  %s3247_s10 = sand.u32 1, %s2578_s19   ;;  %p733_p11 = scmp.lt.s32.totalorder %s2602_s25, 1 }
  0x8d   : > { %s2938_s29 = sshll.u32 %s3247_s10, 3  ;;  %s3302_s3 = sld [smem:[#allocation35_spill]] }
  0x8e   : > { %s2941_s20 = scalar_select %p733_p11, %s2602_s25, 1 }
  0x8f   : > { %s3303_s5 = sld [smem:[#allocation36_spill]]  ;;  %s634_s19 = scalar_lea.vmem [#allocation10], %s2927_s6 }
  0x90   : > { %s2029_s14 = sshll.u32 %s2941_s20, 4  ;;  %s3304_s21 = sld [smem:[#allocation37_spill]] }
  0x91   : > { %s2032_s10 = sshll.u32 %s2941_s20, 5  ;;  %s3305_s7 = sld [smem:[#allocation40_spill]] }
  0x92   : > { %s3306_s1 = sld [smem:[#allocation41_spill]]  ;;  %s2984_s2 = scalar_lea.vmem [#allocation11], %s623_s11 }
  0x93   : > { %s737_s26 = scalar_lea.vmem %s3302_s3, %s2029_s14  ;;  %s3307_s24 = sld [smem:[#allocation42_spill]] }
  0x94   : > { %s3308_s23 = sld [smem:[#allocation44_spill]]  ;;  %p1986_p2 = scmp.ne.s32.totalorder %s2602_s25, 0 }
  0x95   : > { %s2954_s30 = scalar_lea.vmem %s3303_s5, %s2029_s14  ;;  %s3310_s9 = sld [smem:[#allocation22_spill]] (!%p1986_p2) }
  0x96   : > { %s2959_s17 = scalar_lea.vmem %s3304_s21, %s2029_s14  ;;  %s3309_s21 = sld [smem:[#allocation45_spill]] }
  0x97   : > { %s2965_s28 = scalar_lea.vmem %s3305_s7, %s2032_s10  ;;  %s732_s7 = scalar_lea.vmem [#allocation12], %s2938_s29 }
  0x98   : > { %s758_s15 = scalar_lea.vmem %s3306_s1, %s2941_s20  ;;  %772 = sbr.rel (%p1986_p2) target bundleno = 159 (0x9f), region = 104 }
  0x99   : > { %s761_s4 = scalar_lea.vmem %s3307_s24, %s2941_s20 }
  0x9a   : > { %s764_s0 = scalar_lea.vmem %s3308_s23, %s2941_s20 }
  0x9b   : > { %s1987_s10 = sshll.u32 (!%p1986_p2), %s3310_s9, 3 }
  0x9c   : > { %s767_s22 = scalar_lea.vmem %s3309_s21, %s2941_s20  ;;  %s774_s3 = scalar_lea.vmem (!%p1986_p2), [#allocation4], %s1987_s10 }
  0x9d   : > { %vm777_vm0 = vcmask 261120   ;;  %v775_v0 = vld [vmem:[%s774_s3] sm:$0xff]  ;;  %s776_s12 = scalar_lea.vmem [#allocation2], %s1987_s10 }
  0x9e   : > { %778 = vst.msk [vmem:[%s776_s12] sm:$0xff] %vm777_vm0, %v775_v0 }
  0x9f PF: > { %s3311_s23 = sld [smem:[#allocation22_spill]]  ;;  %v2316_v1 = vld [vmem:[%s737_s26 + $0x8] sm:$0xff]   ;;  %v2625_v2 = vmov 0   ;;  %v2626_v3 = vmov 0.0   ;;  %v2317_v4 = vld [vmem:[%s737_s26] sm:$0xff]   ;;  %vm2627_vm1 = vmmov 0   ;;  %s3316_s12 = scalar_lea.vmem %s3223_s8, %s2941_s20 }
  0xa0   : > { %2315 = vset.pattern.permute.xlu0 %v2625_v2  ;;  %s3312_s13 = sld [smem:[#allocation33_spill]]  ;;  %2069 = vmatprep.subr.bf16.mxu0 %v2626_v3  ;;  %v2318_v7 = vld [vmem:[%s2954_s30 + $0x8] sm:$0xff]   ;;  %v2320_v9 = vld [vmem:[%s2954_s30] sm:$0xff]   ;;  %vm809_vm2 = vcmask 261120   ;;  %s2628_s26 = smov 120   ;;  %vm972_vm3 = vcmask 64512  }
  0xa1   : > { %2070 = vmatpush3.bf16.msra.mxu0 %v2316_v1  ;;  %2077 = vmatprep.subr.bf16.mxu1 %v2626_v3  ;;  %v2319_v10 = vld [vmem:[%s2959_s17 + $0x8] sm:$0xff]   ;;  %v2321_v11 = vld [vmem:[%s2959_s17] sm:$0xff]   ;;  %vm1034_vm4 = vcmask 1043456   ;;  %s2629_s30 = smov 112   ;;  %s2630_s17 = smov 104   ;;  %vm1196_vm5 = vcmask 130112  }
  0xa2   : > { %2071 = vmatprep.subr.bf16.mxu0 %v2626_v3  ;;  %2073 = vmatprep.mubr.msk.bf16.mxu0 %vm2627_vm1, %v2626_v3  ;;  %v784_v42 = vld [vmem:[#allocation7] sm:$0xff]  ;;  %s2631_s24 = smov 8   ;;  %s2632_s5 = smov 16   ;;  %vm1312_vm6 = vcmask 195712   ;;  %vm1428_vm7 = vcmask 261312   ;;  %vm1630_vm8 = vcmask 523264  }
  0xa3   : > { %2081 = vmatprep.mubr.msk.bf16.mxu1 %vm2627_vm1, %v2626_v3  ;;  %2078 = vmatpush3.bf16.msra.mxu1 %v2318_v7  ;;  %s3313_s14 = scalar_lea.vmem [#allocation9], %s2927_s6  ;;  %s2633_s21 = smov 24  }
  0xa4   : > { %2079 = vmatprep.subr.bf16.mxu1 %v2626_v3  ;;  %s3314_s18 = smov %s3313_s14 }
  0xa5   : > { %s1988_s27 = sshll.u32 %s3311_s23, 3  ;;  %2072 = vmatpush3.bf16.msra.mxu0 %v2317_v4 }
  0xa6   : > { %s782_s1 = scalar_lea.vmem %s3312_s13, %s1988_s27  ;;  %s2994_s25 = scalar_lea.vmem [#allocation2], %s1988_s27  ;;  %2085 = vmatprep.subr.bf16.mxu0 %v2626_v3 }
  0xa7   : > { %v783_v5 = vld [vmem:[%s782_s1] sm:$0xff]  ;;  %2080 = vmatpush3.bf16.msra.mxu1 %v2320_v9  ;;  %s3320_s13 = sld [smem:[#allocation28_spill]] }
  0xa8   : > { %v2997_v6 = vld [vmem:[%s2994_s25] sm:$0xff]  ;;  %788 = vperm.xlu0 %2315, %v783_v5   ;;  %2093 = vmatprep.subr.bf16.mxu1 %v2626_v3 }
  0xa9   : > { %v785_v8 = vpack.c.bf16 %v2997_v6, %v2997_v6 }
  0xab   : > { %2074 = vmatmul.mubr.msk.bf16.vlgmr.msra.gmra.mxu0 %vm809_vm2, %v785_v8 }
  0xac   : > { %2086 = vmatpush3.bf16.msra.mxu0 %v2319_v10  ;;  %2089 = vmatprep.mubr.msk.bf16.mxu0 %vm2627_vm1, %v2626_v3 }
  0xad   : > { %2087 = vmatprep.subr.bf16.mxu0 %v2626_v3  ;;  %p3325_p8 = scmp.ne.s32.totalorder %s3320_s13, 0 }
  0xb0   : > { %2088 = vmatpush3.bf16.msra.mxu0 %v2321_v11 }
  0xb1   : > { %2099 = vmatprep.subr.bf16.mxu0 %v2626_v3 }
 0x123   : > { %v3019_v12 = vpop.permute.xlu0 %788 }
 0x124   : > { %v791_v13 = vmul.f32 %v3019_v12, %v2997_v6 }
 0x126   : > { %v792_v14 = vpack.c.bf16 %v791_v13, %v791_v13 }
 0x128   : > { %2082 = vmatmul.mubr.msk.bf16.vlgmr.msra.gmra.mxu1 %vm809_vm2, %v792_v14  ;;  %2090 = vmatmul.mubr.msk.bf16.vlgmr.msra.gmra.mxu0 %vm809_vm2, %v792_v14 }
 0x129   : > { %2095 = vmatprep.mubr.msk.bf16.mxu1 %vm2627_vm1, %v2626_v3  ;;  %2101 = vmatprep.mubr.msk.bf16.mxu0 %vm2627_vm1, %v2626_v3 }
 0x16b   : > { %v847_v15 = vpop.f32.mrf.mxu0 }
 0x16c   : > { %v853_v16 = vmul.f32 0.35355338, %v847_v15 }
 0x16d   : > { %v2075_v17 = vpop.f32.mrf.mxu0 }
 0x16e   : > { %v969_v18 = vpack.c.bf16 %v853_v16, %v853_v16 }
 0x16f   : > { %v850_v19 = vpop.f32.mrf.mxu0 }
 0x170   : > { %1080 = vrot.lane.b32.xlu1 %v969_v18, %s2628_s26 }
 0x171   : > { %v2076_v20 = vpop.f32.mrf.mxu0 }
 0x1e2   : > { %v1081_v33 = vpop.permute.xlu1 %1080 }
 0x1e8   : > { %v907_v21 = vpop.f32.mrf.mxu1  ;;  %v963_v22 = vpop.f32.mrf.mxu0 }
 0x1e9   : > { %v970_v23 = vpack.c.bf16 %v907_v21, %v907_v21  ;;  %v3030_v24 = vpack.c.bf16 %v963_v22, %v963_v22 }
 0x1ea   : > { %v2083_v25 = vpop.f32.mrf.mxu1  ;;  %v2091_v26 = vpop.f32.mrf.mxu0 }
 0x1eb   : > { %1083 = vrot.lane.b32.xlu0 %v970_v23, %s2628_s26  ;;  %1200 = vrot.lane.b32.xlu1 %v970_v23, %s2629_s30  ;;  %v977_v27 = vsel %vm972_vm3, %v970_v23, 0  ;;  %v1036_v28 = vsel %vm1034_vm4, %v3030_v24, 0 }
 0x1ec   : > { %v910_v29 = vpop.f32.mrf.mxu1  ;;  %v966_v30 = vpop.f32.mrf.mxu0  ;;  %2094 = vmatpush3.bf16.xpose.msra.mxu1 %v977_v27  ;;  %2100 = vmatpush3.bf16.msra.mxu0 %v1036_v28 }
 0x1ed   : > { %2105 = vmatprep.subr.bf16.mxu1 %v2626_v3  ;;  %2111 = vmatprep.subr.bf16.mxu0 %v2626_v3 }
 0x1ee   : > { %v2084_v31 = vpop.f32.mrf.mxu1  ;;  %v2092_v32 = vpop.f32.mrf.mxu0 }
 0x1ef   : > { %1316 = vrot.lane.b32.xlu1 %v970_v23, %s2630_s17  ;;  %1198 = vrot.lane.b32.xlu0 %v969_v18, %s2629_s30 }
 0x1f3   : > { %2096 = vmatmul.mubr.msk.bf16.vlgmr.msra.gmra.mxu1 %vm972_vm3, %v969_v18  ;;  %1314 = vrot.lane.b32.xlu0 %v969_v18, %s2630_s17 }
 0x1f4   : > { %2107 = vmatprep.mubr.msk.bf16.mxu1 %vm2627_vm1, %v2626_v3 }
 0x25d   : > { %v1084_v34 = vpop.permute.xlu0 %1083  ;;  %v1201_v36 = vpop.permute.xlu1 %1200 }
 0x25e   : > { %v1089_v35 = vsel %vm972_vm3, %v1084_v34, 0  ;;  %v1206_v37 = vsel %vm972_vm3, %v1201_v36, 0 }
 0x25f   : > { %2106 = vmatpush3.bf16.xpose.msra.mxu1 %v1089_v35 }
 0x260   : > { %2117 = vmatprep.subr.bf16.mxu1 %v2626_v3 }
 0x261   : > { %v1317_v38 = vpop.permute.xlu1 %1316  ;;  %v1199_v39 = vpop.permute.xlu0 %1198 }
 0x262   : > { %v1322_v40 = vsel %vm972_vm3, %v1317_v38, 0 }
 0x265   : > { %v1315_v41 = vpop.permute.xlu0 %1314 }
 0x266   : > { %2108 = vmatmul.mubr.msk.bf16.vlgmr.msra.gmra.mxu1 %vm972_vm3, %v1081_v33 }
 0x267   : > { %2118 = vmatpush3.bf16.xpose.msra.mxu1 %v1206_v37  ;;  %2119 = vmatprep.mubr.msk.bf16.mxu1 %vm2627_vm1, %v2626_v3 }
 0x268   : > { %2129 = vmatprep.subr.bf16.mxu1 %v2626_v3 }
 0x26e   : > { %2120 = vmatmul.mubr.msk.bf16.vlgmr.msra.gmra.mxu1 %vm972_vm3, %v1199_v39 }
 0x26f   : > { %2130 = vmatpush3.bf16.xpose.msra.mxu1 %v1322_v40  ;;  %2131 = vmatprep.mubr.msk.bf16.mxu1 %vm2627_vm1, %v2626_v3 }
 0x270   : > { %2141 = vmatprep.subr.bf16.mxu1 %v2626_v3 }
 0x276   : > { %2132 = vmatmul.mubr.msk.bf16.vlgmr.msra.gmra.mxu1 %vm972_vm3, %v1315_v41 }
 0x277   : > { %2145 = vmatprep.mubr.msk.bf16.mxu1 %vm2627_vm1, %v2626_v3 }
 0x2b3   : > { %v1013_v43 = vpop.f32.mrf.mxu1 }
 0x2b4   : > { %v1014_v44 = vadd.f32 %v1013_v43, %v784_v42 }
 0x2b5   : > { %v2097_v45 = vpop.f32.mrf.mxu1 }
 0x2b6   : > { %v1019_v46 = vsel %vm972_vm3, %v1014_v44, -inf }
 0x2b7   : > { %1020 = vmax.xlane.f32.xlu1 %v1019_v46  ;;  %v1016_v47 = vpop.f32.mrf.mxu1 }
 0x2b9   : > { %v2098_v48 = vpop.f32.mrf.mxu1 }
 0x326   : > { %v1125_v49 = vpop.f32.mrf.mxu1 }
 0x327   : > { %v1126_v50 = vadd.f32 %v1125_v49, %v784_v42 }
 0x328   : > { %v2109_v51 = vpop.f32.mrf.mxu1 }
 0x329   : > { %v1131_v52 = vsel %vm972_vm3, %v1126_v50, -inf }
 0x32a   : > { %1132 = vmax.xlane.f32.xlu0 %v1131_v52  ;;  %v1128_v53 = vpop.f32.mrf.mxu1 }
 0x32c   : > { %v2110_v54 = vpop.f32.mrf.mxu1 }
 0x32e   : > { %v1242_v55 = vpop.f32.mrf.mxu1 }
 0x32f   : > { %v1243_v56 = vadd.f32 %v1242_v55, %v784_v42 }
 0x330   : > { %v2121_v57 = vpop.f32.mrf.mxu1 }
 0x331   : > { %v1248_v58 = vsel %vm972_vm3, %v1243_v56, -inf }
 0x332   : > { %1249 = vmax.xlane.f32.xlu0 %v1248_v58  ;;  %v1245_v59 = vpop.f32.mrf.mxu1 }
 0x334   : > { %v2122_v60 = vpop.f32.mrf.mxu1 }
 0x335   : > { %v2322_v60 = vld [vmem:[%s3313_s14 + $0x8] sm:$0xff]  }
 0x336   : > { %v1358_v61 = vpop.f32.mrf.mxu1  ;;  %2142 = vmatpush3.bf16.msra.mxu1 %v2322_v60  ;;  %v2021_v60 = vld [vmem:[%s764_s0] ss:$0 sm:$0xff] }
 0x337   : > { %v1359_v62 = vadd.f32 %v1358_v61, %v784_v42  ;;  %v2323_v61 = vld [vmem:[%s3314_s18] sm:$0xff]   ;;  %2143 = vmatprep.subr.bf16.mxu1 %v2626_v3  ;;  %s3322_s18 = sld [smem:[#allocation46_spill]] }
 0x338   : > { %v2133_v63 = vpop.f32.mrf.mxu1 }
 0x339   : > { %v1364_v0 = vsel %vm972_vm3, %v1359_v62, -inf }
 0x33a   : > { %1365 = vmax.xlane.f32.xlu1 %v1364_v0  ;;  %v1361_v1 = vpop.f32.mrf.mxu1  ;;  %2144 = vmatpush3.bf16.msra.mxu1 %v2323_v61 }
 0x33b   : > { %2157 = vmatprep.subr.bf16.mxu1 %v2626_v3 }
 0x33c   : > { %v2134_v2 = vpop.f32.mrf.mxu1 }
 0x33d   : > { %s3323_s6 = smov %s3322_s18 }
 0x340   : > { %v1021_v4 = vpop.xlane.xlu1 %1020 }
 0x341   : > { %v1022_v5 = vsub.f32 %v1014_v44, %v1021_v4 }
 0x343   : > { %v1023_v7 = vmul.f32 1.442695, %v1022_v5 }
 0x345   : > { %2330 = vpow2.f32 %v1023_v7 }
 0x352   : > { %v2331_v8 = vpop.eup %2330 }
 0x353   : > { %v1025_v9 = vsel %vm972_vm3, %v2331_v8, 0.0 }
 0x354   : > { %1026 = vadd.xlane.f32.xlu0 %v1025_v9 }
 0x3b3   : > { %v1133_v10 = vpop.xlane.xlu0 %1132 }
 0x3b4   : > { %v1134_v11 = vsub.f32 %v1126_v50, %v1133_v10 }
 0x3b6   : > { %v1135_v13 = vmul.f32 1.442695, %v1134_v11 }
 0x3b8   : > { %2332 = vpow2.f32 %v1135_v13 }
 0x3bb   : > { %v1250_v14 = vpop.xlane.xlu0 %1249 }
 0x3bc   : > { %v1251_v15 = vsub.f32 %v1243_v56, %v1250_v14 }
 0x3be   : > { %v1252_v16 = vmul.f32 1.442695, %v1251_v15 }
 0x3c0   : > { %2334 = vpow2.f32 %v1252_v16 }
 0x3c3   : > { %v1366_v22 = vpop.xlane.xlu1 %1365 }
 0x3c4   : > { %v1367_v23 = vsub.f32 %v1359_v62, %v1366_v22  ;;  %v2326_v22 = vld [vmem:[%s2965_s28 + $0x18] sm:$0xff]  }
 0x3c5   : > { %v2333_v17 = vpop.eup %2332 }
 0x3c6   : > { %v1137_v18 = vsel %vm972_vm3, %v2333_v17, 0.0  ;;  %v1368_v25 = vmul.f32 1.442695, %v1367_v23  ;;  %v2327_v23 = vld [vmem:[%s2965_s28 + $0x10] sm:$0xff]  }
 0x3c7   : > { %1138 = vadd.xlane.f32.xlu1 %v1137_v18 }
 0x3cd   : > { %v2335_v19 = vpop.eup %2334 }
 0x3ce   : > { %v1254_v20 = vsel %vm972_vm3, %v2335_v19, 0.0 }
 0x3cf   : > { %1255 = vadd.xlane.f32.xlu0 %v1254_v20 }
 0x3d8   : > { %1260 = vrot.lane.b32.xlu1 %v3030_v24, %s2629_s30 }
 0x3dd   : > { %v1027_v21 = vpop.xlane.xlu0 %1026 }
 0x3de   : > { %2336 = vrcp.f32 %v1027_v21  ;;  %v2324_v21 = vld [vmem:[%s634_s19 + $0x8] sm:$0xff]  }
 0x3df   : > { %2338 = vpow2.f32 %v1368_v25 }
 0x3e5   : > { %1144 = vrot.lane.b32.xlu0 %v3030_v24, %s2628_s26 }
 0x3eb   : > { %v2337_v26 = vpop.eup %2336 }
 0x3ec   : > { %v1029_v27 = vmul.f32 %v2337_v26, %v2331_v8  ;;  %v2339_v29 = vpop.eup %2338 }
 0x3ed   : > { %v1370_v30 = vsel %vm972_vm3, %v2339_v29, 0.0 }
 0x3ee   : > { %v1030_v28 = vpack.c.bf16 %v1029_v27, %v1029_v27 }
 0x3f0   : > { %2102 = vmatmul.mubr.msk.bf16.vlgmr.msra.gmra.mxu0 %vm972_vm3, %v1030_v28 }
 0x3f1   : > { %2113 = vmatprep.mubr.msk.bf16.mxu0 %vm2627_vm1, %v2626_v3 }
 0x3fc   : > { %1371 = vadd.xlane.f32.xlu1 %v1370_v30 }
 0x40d   : > { %1376 = vrot.lane.b32.xlu1 %v3030_v24, %s2630_s17  ;;  %s2024_s17 = sshll.u32 %s3311_s23, 7  ;;  %s2634_s23 = smov [#allocation12]  }
 0x450   : > { %v1139_v31 = vpop.xlane.xlu1 %1138 }
 0x451   : > { %2340 = vrcp.f32 %v1139_v31  ;;  %v2010_v31 = vld [vmem:[%s2984_s2] ss:$0 sm:$0xff] }
 0x454   : > { %v1261_v37 = vpop.permute.xlu1 %1260 }
 0x455   : > { %v1266_v39 = vsel %vm1034_vm4, %v1261_v37, 0  ;;  %v2011_v37 = vld [vmem:[%s3316_s12] ss:$0 sm:$0xff] }
 0x458   : > { %v1256_v32 = vpop.xlane.xlu0 %1255 }
 0x459   : > { %2342 = vrcp.f32 %v1256_v32 }
 0x45c   : > { %v1145_v33 = vpop.permute.xlu0 %1144 }
 0x45d   : > { %v1150_v34 = vsel %vm1034_vm4, %v1145_v33, 0 }
 0x45e   : > { %v2341_v35 = vpop.eup %2340  ;;  %2112 = vmatpush3.bf16.msra.mxu0 %v1150_v34 }
 0x45f   : > { %2123 = vmatprep.subr.bf16.mxu0 %v2626_v3  ;;  %v1141_v36 = vmul.f32 %v2341_v35, %v2333_v17  ;;  %v2328_v35 = vld [vmem:[%s2965_s28 + $0x8] sm:$0xff]  }
 0x461   : > { %v1142_v38 = vpack.c.bf16 %v1141_v36, %v1141_v36  ;;  %v2329_v36 = vld [vmem:[%s2965_s28] sm:$0xff]   ;;  %s3318_s28 = sld [smem:[#allocation18_spill]] }
 0x463   : > { %2114 = vmatmul.mubr.msk.bf16.vlgmr.msra.gmra.mxu0 %vm972_vm3, %v1142_v38 }
 0x464   : > { %2124 = vmatpush3.bf16.msra.mxu0 %v1266_v39  ;;  %2125 = vmatprep.mubr.msk.bf16.mxu0 %vm2627_vm1, %v2626_v3 }
 0x465   : > { %2135 = vmatprep.subr.bf16.mxu0 %v2626_v3 }
 0x466   : > { %v2343_v24 = vpop.eup %2342 }
 0x467   : > { %v1258_v40 = vmul.f32 %v2343_v24, %v2335_v19  ;;  %s3324_s20 = sand.u32 1, %s3318_s28  }
 0x469   : > { %v1259_v41 = vpack.c.bf16 %v1258_v40, %v1258_v40 }
 0x46b   : > { %2126 = vmatmul.mubr.msk.bf16.vlgmr.msra.gmra.mxu0 %vm972_vm3, %v1259_v41 }
 0x46c   : > { %2137 = vmatprep.mubr.msk.bf16.mxu0 %vm2627_vm1, %v2626_v3 }
 0x485   : > { %v1372_v42 = vpop.xlane.xlu1 %1371 }
 0x486   : > { %2344 = vrcp.f32 %v1372_v42 }
 0x489   : > { %v1377_v43 = vpop.permute.xlu1 %1376 }
 0x48a   : > { %v1382_v44 = vsel %vm1034_vm4, %v1377_v43, 0 }
 0x48b   : > { %2136 = vmatpush3.bf16.msra.mxu0 %v1382_v44 }
 0x48c   : > { %2149 = vmatprep.subr.bf16.mxu0 %v2626_v3 }
 0x493   : > { %v2345_v45 = vpop.eup %2344 }
 0x494   : > { %v1374_v46 = vmul.f32 %v2345_v45, %v2339_v29  ;;  %v2009_v29 = vld [vmem:[%s761_s4] ss:$0 sm:$0xff] }
 0x496   : > { %v1375_v47 = vpack.c.bf16 %v1374_v46, %v1374_v46 }
 0x498   : > { %2138 = vmatmul.mubr.msk.bf16.vlgmr.msra.gmra.mxu0 %vm972_vm3, %v1375_v47 }
 0x499   : > { %2153 = vmatprep.mubr.msk.bf16.mxu0 %vm2627_vm1, %v2626_v3  ;;  %2150 = vmatpush3.bf16.msra.mxu0 %v2324_v21 }
 0x49a   : > { %2151 = vmatprep.subr.bf16.mxu0 %v2626_v3 }
 0x4b0   : > { %v1072_v48 = vpop.f32.mrf.mxu0 }
 0x4b1   : > { %1078 = vst.msk [vmem:[#allocation3] sm:$0xff] %vm972_vm3, %v1072_v48 }
 0x4b2   : > { %v2103_v49 = vpop.f32.mrf.mxu0 }
 0x4b4   : > { %v1075_v50 = vpop.f32.mrf.mxu0 }
 0x4b6   : > { %v2104_v51 = vpop.f32.mrf.mxu0 }
 0x523   : > { %v1186_v52 = vpop.f32.mrf.mxu0 }
 0x524   : > { %1193 = vrot.lane.b32.xlu0 %v1186_v52, %s2631_s24  ;;  %s1721_s24 = sshll.u32 %s732_s7, 4  ;;  %s1722_s24 = int_to_ptr.vmem [resolvable:$true] %s1721_s24 }
 0x525   : > { %v2115_v53 = vpop.f32.mrf.mxu0  ;;  %s2486_s0 = scalar_lea.vmem %s1722_s24, 128 }
 0x526   : > { %p2487_p12 = scmp.ne.s32.totalorder %s1722_s24, %s2486_s0 }
 0x527   : > { %v1189_v54 = vpop.f32.mrf.mxu0 }
 0x528   : > { %p2488_p13 = pnand %p2487_p12, %p3325_p8 }
 0x529   : > { %v2116_v55 = vpop.f32.mrf.mxu0 }
 0x52a   : > { %p2489_p1 = pneg %p2488_p13 }
 0x52b   : > { %v1302_v56 = vpop.f32.mrf.mxu0 }
 0x52c   : > { %1309 = vrot.lane.b32.xlu1 %v1302_v56, %s2632_s5 }
 0x52d   : > { %v2127_v57 = vpop.f32.mrf.mxu0 }
 0x52f   : > { %v1305_v58 = vpop.f32.mrf.mxu0 }
 0x531   : > { %v2128_v59 = vpop.f32.mrf.mxu0 }
 0x558   : > { %v1418_v62 = vpop.f32.mrf.mxu0 }
 0x559   : > { %1425 = vrot.lane.b32.xlu0 %v1418_v62, %s2633_s21  ;;  %v2022_v62 = vld [vmem:[%s767_s22] ss:$0 sm:$0xff]  ;;  %s3153_s21 = scalar_lea.hbm %s3322_s18, %s2024_s17  ;;  %s1708_s22 = scalar_lea.sflag [#allocation6], %s3324_s20 }
 0x55a   : > { %v2139_v63 = vpop.f32.mrf.mxu0 }
 0x55c   : > { %v1421_v0 = vpop.f32.mrf.mxu0 }
 0x55e   : > { %v2140_v1 = vpop.f32.mrf.mxu0 }
 0x596   : > { %v1194_v2 = vpop.permute.xlu0 %1193 }
 0x597   : > { %1197 = vst.msk [vmem:[#allocation3] sm:$0xff] %vm1196_vm5, %v1194_v2 }
 0x59e   : > { %v1310_v4 = vpop.permute.xlu1 %1309 }
 0x59f   : > { %1313 = vst.msk [vmem:[#allocation3] sm:$0xff] %vm1312_vm6, %v1310_v4 }
 0x5cb   : > { %v1426_v5 = vpop.permute.xlu0 %1425 }
 0x5cc   : > { %1429 = vst.msk [vmem:[#allocation3] sm:$0xff] %vm1428_vm7, %v1426_v5 }
 0x5d3   : > { %v1430_v7 = vld [vmem:[#allocation3] sm:$0xff] }
 0x5d4   : > { %v1431_v8 = vpack.c.bf16 %v1430_v7, %v1430_v7 }
 0x5d6   : > { %2146 = vmatmul.mubr.msk.bf16.vlgmr.msra.gmra.mxu1 %vm809_vm2, %v1431_v8 }
 0x5d7   : > { %2165 = vmatprep.mubr.msk.bf16.mxu1 %vm2627_vm1, %v2626_v3  ;;  %2158 = vmatpush3.bf16.msra.mxu1 %v2326_v22 }
 0x5d8   : > { %2159 = vmatprep.subr.bf16.mxu1 %v2626_v3 }
 0x5db   : > { %2160 = vmatpush3.bf16.msra.mxu1 %v2327_v23 }
 0x5dc   : > { %2161 = vmatprep.subr.bf16.mxu1 %v2626_v3 }
 0x5df   : > { %2162 = vmatpush3.bf16.msra.mxu1 %v2328_v35 }
 0x5e0   : > { %2163 = vmatprep.subr.bf16.mxu1 %v2626_v3  ;;  %v2015_v3 = vld [vmem:[%s758_s15] ss:$0 sm:$0xff] }
 0x5e3   : > { %2164 = vmatpush3.bf16.msra.mxu1 %v2329_v36 }
 0x696   : > { %v1485_v9 = vpop.f32.mrf.mxu1 }
 0x697   : > { %v1491_v10 = vadd.f32 %v1485_v9, %v2997_v6  ;;  %v2325_v6 = vld [vmem:[%s634_s19] sm:$0xff]   ;;  %s2490_s19 = sshll.u32 %s2634_s23, 4  ;;  %s2491_s19 = int_to_ptr.vmem [resolvable:$false] %s2490_s19 }
 0x698   : > { %v2147_v11 = vpop.f32.mrf.mxu1  ;;  %2152 = vmatpush3.bf16.msra.mxu0 %v2325_v6  ;;  %s2492_s9 = scalar_lea.vmem %s2491_s19, 256  ;;  %p2493_p9 = scmp.lt.s32.totalorder %s1722_s24, %s2491_s19 }
 0x699   : > { %v1494_v13 = vsel %vm809_vm2, %v1491_v10, 0.0  ;;  %p2494_p7 = scmp.lt.s32.totalorder %s2492_s9, %s2486_s0 }
 0x69a   : > { %1495 = vadd.xlane.f32.xlu1 %v1494_v13  ;;  %v1488_v14 = vpop.f32.mrf.mxu1 }
 0x69b   : > { %p2495_p4 = por %p2494_p7, %p2493_p9 }
 0x69c   : > { %v2148_v15 = vpop.f32.mrf.mxu1 }
 0x69d   : > { %p2496_p0 = pnand %p2495_p4, %p2489_p1 }
 0x723   : > { %v1496_v16 = vpop.xlane.xlu1 %1495 }
 0x724   : > { %v1498_v17 = vmul.f32 0.03125, %v1496_v16 }
 0x726   : > { %v1499_v18 = vsub.f32 %v1491_v10, %v1498_v17 }
 0x728   : > { %v1500_v19 = vmul.f32 %v1499_v18, %v1499_v18 }
 0x72a   : > { %v1501_v20 = vsel %vm809_vm2, %v1500_v19, 0.0 }
 0x72b   : > { %1502 = vadd.xlane.f32.xlu0 %v1501_v20 }
 0x7b4   : > { %v1503_v25 = vpop.xlane.xlu0 %1502 }
 0x7b5   : > { %v1504_v26 = vmul.f32 0.03125, %v1503_v25 }
 0x7b7   : > { %v1505_v27 = vadd.f32 1e-05, %v1504_v26 }
 0x7b9   : > { %2346 = vrsqrt.f32 %v1505_v27 }
 0x7c6   : > { %v2347_v28 = vpop.eup %2346 }
 0x7c7   : > { %v1507_v30 = vmul.f32 %v2347_v28, %v1499_v18 }
 0x7c9   : > { %v1514_v32 = vmul.f32 %v2009_v29, %v1507_v30 }
 0x7cb   : > { %v1521_v33 = vadd.f32 %v2010_v31, %v1514_v32 }
 0x7cd   : > { %v1522_v34 = vpack.c.bf16 %v1521_v33, %v1521_v33 }
 0x7cf   : > { %2154 = vmatmul.mubr.msk.bf16.vlgmr.msra.gmra.mxu0 %vm809_vm2, %v1522_v34 }
 0x88f   : > { %v1583_v38 = vpop.f32.mrf.mxu0 }
 0x890   : > { %v1584_v39 = vadd.f32 %v2011_v37, %v1583_v38 }
 0x891   : > { %v2155_v24 = vpop.f32.mrf.mxu0 }
 0x892   : > { %v1589_v40 = vmax.f32 %v1584_v39, 0.0 }
 0x893   : > { %v1586_v41 = vpop.f32.mrf.mxu0 }
 0x894   : > { %v1590_v42 = vpack.c.bf16 %v1589_v40, %v1589_v40 }
 0x895   : > { %v2156_v43 = vpop.f32.mrf.mxu0 }
 0x896   : > { %2166 = vmatmul.mubr.msk.bf16.vlgmr.msra.gmra.mxu1 %vm1630_vm8, %v1590_v42 }
 0x956   : > { %v1668_v44 = vpop.f32.mrf.mxu1 }
 0x957   : > { %v1669_v45 = vadd.f32 %v2015_v3, %v1668_v44 }
 0x958   : > { %v2167_v46 = vpop.f32.mrf.mxu1 }
 0x959   : > { %v1674_v47 = vadd.f32 %v1669_v45, %v1521_v33 }
 0x95a   : > { %v1671_v48 = vpop.f32.mrf.mxu1 }
 0x95b   : > { %v1677_v49 = vsel %vm809_vm2, %v1674_v47, 0.0 }
 0x95c   : > { %1678 = vadd.xlane.f32.xlu0 %v1677_v49  ;;  %v2168_v50 = vpop.f32.mrf.mxu1 }
 0x9e5   : > { %v1679_v51 = vpop.xlane.xlu0 %1678 }
 0x9e6   : > { %v1680_v52 = vmul.f32 0.03125, %v1679_v51 }
 0x9e8   : > { %v1681_v53 = vsub.f32 %v1674_v47, %v1680_v52 }
 0x9ea   : > { %v1682_v54 = vmul.f32 %v1681_v53, %v1681_v53 }
 0x9ec   : > { %v1683_v55 = vsel %vm809_vm2, %v1682_v54, 0.0 }
 0x9ed   : > { %1684 = vadd.xlane.f32.xlu1 %v1683_v55 }
 0xa76   : > { %v1685_v56 = vpop.xlane.xlu1 %1684 }
 0xa77   : > { %v1686_v57 = vmul.f32 0.03125, %v1685_v56 }
 0xa79   : > { %v1687_v58 = vadd.f32 1e-05, %v1686_v57 }
 0xa7b   : > { %2348 = vrsqrt.f32 %v1687_v58 }
 0xa88   : > { %v2349_v59 = vpop.eup %2348 }
 0xa89   : > { %v1689_v61 = vmul.f32 %v2349_v59, %v1681_v53 }
 0xa8b   : > { %v1696_v63 = vmul.f32 %v2021_v60, %v1689_v61 }
 0xa8d   : > { %v1703_v0 = vadd.f32 %v2022_v62, %v1696_v63 }
 0xa8f   : > { %v1704_v1 = vmul.f32 %v1703_v0, %v3019_v12 }
 0xa91   : > { %1705 = vst.msk [vmem:[%s2994_s25] sm:$0xff] %vm809_vm2, %v1704_v1  ;;  %1706 = vst.msk [vmem:[%s732_s7] sm:$0xff] %vm809_vm2, %v1704_v1 }
 0xa92   : > { %2499 = shalt.err (!%p2496_p0)
}
 0xa93   : > { %s2500_s29 = scalar_lea.hbm %s3153_s21, 128  ;;  %s2504_s10 = scalar_lea.hbm %s3323_s6, 256 }
 0xa94   : > { %p2501_p5 = scmp.ne.s32.totalorder %s3153_s21, %s2500_s29  ;;  %p2505_p3 = scmp.lt.s32.totalorder %s3153_s21, %s3323_s6 }
 0xa95   : > { %p2506_p11 = scmp.lt.s32.totalorder %s2504_s10, %s2500_s29 }
 0xa96   : > { %p2502_p10 = pnand %p2501_p5, %p3325_p8 }
 0xa97   : > { %p2507_p2 = por %p2506_p11, %p2505_p3 }
 0xa98   : > { %p2503_p6 = pneg %p2502_p10 }
 0xa9a   : > { %p2508_p12 = pnand %p2507_p2, %p2503_p6 }
 0xa9c   : > { %2511 = shalt.err (!%p2508_p12)
}
 0xa9d   : > { %2183 = dma.vmem_to_hbm [thread:$0]  (%p3325_p8), %s1722_s24, 128, %s3153_s21, %s1708_s22  }
 0xa9e PF: > { %s3326_s4 = sld [smem:[#allocation25_spill]] }
 0xa9f   : > { %s3327_s2 = sld [smem:[#allocation17_spill]] }
 0xaa0   : > { %s3328_s27 = sld [smem:[#allocation29_spill]] }
 0xaa4   : > { %p2211_p13 = scmp.ge.s32.totalorder %s3326_s4, 2 }
 0xaa5   : > { %s1733_s28 = sand.u32 1, %s3327_s2  }
 0xaa6   : > { %p3329_p1 = scmp.ne.s32.totalorder %s3328_s27, 0  ;;  %s1734_s15 = scalar_lea.sflag [#allocation6], %s1733_s28 }
 0xaa8   : > { %p2203_p9 = pnand %p2211_p13, %p3329_p1 }
 0xaaa   : > { %p2204_p7 = pneg %p2203_p9 }
 0xaac   : > { %2569 = dma.done.wait (%p2204_p7), %s1734_s15, 128  }
 0xaad   : > { %2571 = vsyncadd (%p2204_p7), %s1734_s15, 4294967168  ;;  %s30_s28 = sadd.s32 1, %s3326_s4   ;;  %s3330_s18 = sld [smem:[#allocation18_spill]] }
 0xaae   : > { %p27_p4 = scmp.ge.s32.totalorder %s30_s28, 6   ;;  %s3331_s19 = sld [smem:[#allocation19_spill]] }
 0xaaf   : > { %s3332_s20 = sld [smem:[#allocation27_spill]] }
 0xab0   : > { %s3333_s21 = sld [smem:[#allocation20_spill]] }
 0xab1   : > { %s3334_s22 = sld [smem:[#allocation21_spill]] }
 0xab2   : > { %s3335_s23 = sld [smem:[#allocation31_spill]]  ;;  %29 = sbr.rel (!%p27_p4) target bundleno = 25 (0x19), region = 189 }
 0xab3   : > { %s3336_s24 = sld [smem:[#allocation23_spill]] }
 0xab4   : > { %s3337_s25 = sld [smem:[#allocation24_spill]] }
 0xab5   : > { %s3338_s26 = sld [smem:[#allocation26_spill]] }
 0xab6   : > { %s3339_s27 = sld [smem:[#allocation30_spill]] }
 0xab7   :  { %1739 = vsyncpa [#allocation5], 1 }
 0xab8   :  { %1741 = vsyncpa [#allocation5 + $0x1], 1 }
 0xab9   :  { %1742 = vsyncpa [#allocation8], 1 }
 0xaba   :  { %1743 = vsyncpa [#allocation6], 1 }
 0xabb   :  { %1745 = vsyncpa [#allocation6 + $0x1], 1 }

</bundles_post_ra>
